<compile_context>
chip_gen: v7x
topology: tpu7x:2x2x1
jax: 0.10.0
libtpu: 0.0.40
codegen_flags: <defaults>
</compile_context>

<pallas_src>
import functools

import numpy as np
import jax
import jax.numpy as jnp
from jax.experimental import pallas as pl
from jax.experimental.pallas import tpu as pltpu


# ----------------------------- fused Pallas kernel ---------------------------


def _net_kernel(x_ref, m1_ref, s1_ref, m2_ref, s2_ref,
                w1r_ref, w2p_ref, bias_ref, o_ref):
    """conv1+pool -> conv2+pool -> fc1+relu -> fc2 for one image, all in VMEM."""
    f32 = jnp.float32
    x = x_ref[0]                                                    # (28, 28)

    bias = bias_ref[...]                                            # (4, 256)
    b1 = bias[0:1, 0:144]
    b2 = bias[1:2, 0:128]
    b1f = bias[2:3, 0:64]
    b2f = bias[3:4, 0:128]

    # ---- conv1 (1->6, 5x5): 5 row-tap matmuls, tree-added.
    #      Column layout is parity-folded: lanes 0..71 = even-wo (wp*6+co),
    #      lanes 72..143 = odd-wo, so the width pool is a plain half-vs-half max.
    d0 = jnp.dot(x[0:24, :], m1_ref[0], preferred_element_type=f32)
    d1 = jnp.dot(x[1:25, :], m1_ref[1], preferred_element_type=f32)
    d2 = jnp.dot(x[2:26, :], m1_ref[2], preferred_element_type=f32)
    d3 = jnp.dot(x[3:27, :], m1_ref[3], preferred_element_type=f32)
    d4 = jnp.dot(x[4:28, :], m1_ref[4], preferred_element_type=f32)
    y1 = ((d0 + d1) + (d2 + d3)) + d4                               # (24, 144)
    y1 = jnp.maximum(y1 + b1, 0.0)                                  # bias+ReLU
    pw = jnp.maximum(y1[:, :72], y1[:, 72:])                        # width pool
    # height pool: even/odd row selection via constant 0/1 matmul + max
    zh = jnp.dot(s1_ref[...], pw, preferred_element_type=f32)       # (24, 72)
    p1 = jnp.maximum(zh[:12, :], zh[12:, :])                        # (12, 72)

    # ---- conv2 (6->16, 5x5): same scheme; parity-folded columns:
    #      lanes 0..63 = even-wo (wp*16+co), lanes 64..127 = odd-wo.
    e0 = jnp.dot(p1[0:8, :], m2_ref[0], preferred_element_type=f32)
    e1 = jnp.dot(p1[1:9, :], m2_ref[1], preferred_element_type=f32)
    e2 = jnp.dot(p1[2:10, :], m2_ref[2], preferred_element_type=f32)
    e3 = jnp.dot(p1[3:11, :], m2_ref[3], preferred_element_type=f32)
    e4 = jnp.dot(p1[4:12, :], m2_ref[4], preferred_element_type=f32)
    y2 = ((e0 + e1) + (e2 + e3)) + e4                               # (8, 128)
    y2 = jnp.maximum(y2 + b2, 0.0)
    pw2 = jnp.maximum(y2[:, :64], y2[:, 64:])                       # (8, 64)
    zh2 = jnp.dot(s2_ref[...], pw2, preferred_element_type=f32)     # (8, 64)
    p2 = jnp.maximum(zh2[:4, :], zh2[4:, :])                        # (4, 64)

    # ---- Dropout2d: identity (eval mode). ----
    # ---- fc1 + ReLU: (C,H,W) flatten folded into W1R; 4 dots, tree-added ----
    g0 = jnp.dot(p2[0:1, :], w1r_ref[0], preferred_element_type=f32)
    g1 = jnp.dot(p2[1:2, :], w1r_ref[1], preferred_element_type=f32)
    g2 = jnp.dot(p2[2:3, :], w1r_ref[2], preferred_element_type=f32)
    g3 = jnp.dot(p2[3:4, :], w1r_ref[3], preferred_element_type=f32)
    h = jnp.maximum(((g0 + g1) + (g2 + g3)) + b1f, 0.0)             # (1, 64)

    # ---- fc2, zero-padded to 128 lanes -> lane-dense store ----
    logits = jnp.dot(h, w2p_ref[...], preferred_element_type=f32) + b2f  # (1,128)
    o_ref[0] = jnp.broadcast_to(logits, (8, 128))


def _fused_net_call(x3d, p):
    B = x3d.shape[0]
    return pl.pallas_call(
        _net_kernel,
        out_shape=jax.ShapeDtypeStruct((B, 8, 128), jnp.float32),
        grid=(B,),
        in_specs=[
            pl.BlockSpec((1, 28, 28), lambda b: (b, 0, 0)),        # per-image x
            pl.BlockSpec((5, 28, 144), lambda b: (0, 0, 0)),       # M1 (resident)
            pl.BlockSpec((24, 24), lambda b: (0, 0)),              # S1
            pl.BlockSpec((5, 72, 128), lambda b: (0, 0, 0)),       # M2
            pl.BlockSpec((8, 8), lambda b: (0, 0)),                # S2
            pl.BlockSpec((4, 64, 64), lambda b: (0, 0, 0)),        # W1R
            pl.BlockSpec((64, 128), lambda b: (0, 0)),             # W2P
            pl.BlockSpec((4, 256), lambda b: (0, 0)),              # packed biases
        ],
        out_specs=pl.BlockSpec((1, 8, 128), lambda b: (b, 0, 0)),
        compiler_params=pltpu.CompilerParams(
            dimension_semantics=("parallel",)),
    )(x3d, p["M1"], p["S1"], p["M2"], p["S2"], p["W1R"], p["W2P"], p["BIASES"])


# ------------------------------- JAX wrappers --------------------------------


def net_logits(x_nchw, params):
    """fc2 logits (B, 3) of Net for a (B, 1, 28, 28) input via the fused kernel."""
    B = x_nchw.shape[0]
    x3d = x_nchw.reshape(B, 28, 28)
    out = _fused_net_call(x3d, params)              # (B, 8, 128); row 0 = logits
    return out[:, 0, :3]


def net_forward(x_nchw, params):
    """Full Net forward; per-image semantics match the PyTorch module (x[0])."""
    theta = net_logits(x_nchw, params)              # (B, 3)
    # Analytic (shots -> inf) hybrid layer: H then RY(theta_i) per qubit gives
    # P(qubit_i = 1) = (1 + sin(theta_i)) / 2; normalize counts of 001/010/100.
    prob1 = 0.5 * (1.0 + jnp.sin(theta))
    prob0 = 1.0 - prob1
    e = jnp.stack([prob1[:, 0] * prob0[:, 1] * prob0[:, 2],   # '001'
                   prob0[:, 0] * prob1[:, 1] * prob0[:, 2],   # '010'
                   prob0[:, 0] * prob0[:, 1] * prob1[:, 2]],  # '100'
                  axis=-1)
    return e / (jnp.sum(e, axis=-1, keepdims=True) + 1e-12)


# --------------------- parameter init & one-time retiling --------------------


def init_raw_params(key):
    """PyTorch-layout synthetic parameters with default-like scaling."""
    ks = jax.random.split(key, 8)

    def u(k, shape, fan_in):
        bound = 1.0 / np.sqrt(fan_in)
        return jax.random.uniform(k, shape, jnp.float32, -bound, bound)

    return {
        "conv1_w": u(ks[0], (6, 1, 5, 5), 25),
        "conv1_b": u(ks[1], (6,), 25),
        "conv2_w": u(ks[2], (16, 6, 5, 5), 150),
        "conv2_b": u(ks[3], (16,), 150),
        "fc1_w": u(ks[4], (64, 256), 256),          # Linear weight (out, in)
        "fc1_b": u(ks[5], (64,), 256),
        "fc2_w": u(ks[6], (3, 64), 64),
        "fc2_b": u(ks[7], (3,), 64),
    }


def build_kernel_params(raw):
    """One-time host-side rearrangement of weights into kernel-friendly matrices."""
    c1w = np.asarray(raw["conv1_w"]); c1b = np.asarray(raw["conv1_b"])
    c2w = np.asarray(raw["conv2_w"]); c2b = np.asarray(raw["conv2_b"])
    f1w = np.asarray(raw["fc1_w"]);  f1b = np.asarray(raw["fc1_b"])
    f2w = np.asarray(raw["fc2_w"]);  f2b = np.asarray(raw["fc2_b"])

    # conv1 row-tap matrices: M1[dy][wo+dx, wo*6+co] = w1[co,0,dy,dx]
    M1 = np.zeros((5, 28, 144), np.float32)
    for dy in range(5):
        for wo in range(24):
            for dx in range(5):
                M1[dy, wo + dx, wo * 6:(wo + 1) * 6] = c1w[:, 0, dy, dx]
    B1 = np.tile(c1b, 24).reshape(1, 144).astype(np.float32)

    # Width-pool parity fold (replaces the old C1 selection matmul):
    # new col wp*6+co <- even wo=2wp ; new col 72+wp*6+co <- odd wo=2wp+1
    perm1 = np.empty(144, np.int64)
    for wp in range(12):
        for co in range(6):
            perm1[wp * 6 + co] = (2 * wp) * 6 + co
            perm1[72 + wp * 6 + co] = (2 * wp + 1) * 6 + co
    M1 = np.ascontiguousarray(M1[:, :, perm1])
    B1 = np.ascontiguousarray(B1[:, perm1])

    # conv1 height-pool selector (even rows -> 0..11, odd rows -> 12..23)
    S1 = np.zeros((24, 24), np.float32)
    for hp in range(12):
        S1[hp, 2 * hp] = 1.0
        S1[12 + hp, 2 * hp + 1] = 1.0

    # conv2 row-tap matrices: M2[dy][(w*6+c), wo*16+co] = w2[co,c,dy,w-wo]
    M2 = np.zeros((5, 72, 128), np.float32)
    for dy in range(5):
        for wo in range(8):
            for dx in range(5):
                for c in range(6):
                    M2[dy, (wo + dx) * 6 + c, wo * 16:(wo + 1) * 16] = c2w[:, c, dy, dx]
    B2 = np.tile(c2b, 8).reshape(1, 128).astype(np.float32)

    # Width-pool parity fold for conv2 (replaces the old C2 selection matmul)
    perm2 = np.empty(128, np.int64)
    for wp in range(4):
        for co in range(16):
            perm2[wp * 16 + co] = (2 * wp) * 16 + co
            perm2[64 + wp * 16 + co] = (2 * wp + 1) * 16 + co
    M2 = np.ascontiguousarray(M2[:, :, perm2])
    B2 = np.ascontiguousarray(B2[:, perm2])

    S2 = np.zeros((8, 8), np.float32)
    for hp in range(4):
        S2[hp, 2 * hp] = 1.0
        S2[4 + hp, 2 * hp + 1] = 1.0

    # fc1 with PyTorch flatten index i = co*16 + hp*4 + wp folded in:
    # W1R[hp][wp*16+co, j] = fc1_w[j, co*16 + hp*4 + wp]
    W1R = np.zeros((4, 64, 64), np.float32)
    for hp in range(4):
        for wp in range(4):
            for co in range(16):
                W1R[hp, wp * 16 + co, :] = f1w[:, co * 16 + hp * 4 + wp]
    B1F = f1b.reshape(1, 64).astype(np.float32)

    # fc2 padded to 128 lanes.
    W2P = np.zeros((64, 128), np.float32)
    W2P[:, :3] = f2w.T
    B2F = np.zeros((1, 128), np.float32)
    B2F[0, :3] = f2b

    # Pack the four small bias rows into a single operand (fewer tiny DMAs).
    BIASES = np.zeros((4, 256), np.float32)
    BIASES[0, :144] = B1[0]
    BIASES[1, :128] = B2[0]
    BIASES[2, :64] = B1F[0]
    BIASES[3, :128] = B2F[0]

    host = dict(M1=M1, S1=S1, M2=M2, S2=S2, W1R=W1R, W2P=W2P, BIASES=BIASES)
    return {k: jnp.asarray(v) for k, v in host.items()}


# ----------------------------- plain-XLA reference ---------------------------


def reference_logits(x_nchw, raw):
    """Ground-truth fc2 logits via XLA conv/pool/dot (PyTorch semantics)."""
    prec = jax.lax.Precision.HIGHEST
    B = x_nchw.shape[0]
    y = jax.lax.conv_general_dilated(
        x_nchw, raw["conv1_w"], window_strides=(1, 1), padding="VALID",
        dimension_numbers=("NCHW", "OIHW", "NCHW"), precision=prec)
    y = jax.nn.relu(y + raw["conv1_b"].reshape(1, 6, 1, 1))
    y = y.reshape(B, 6, 12, 2, 12, 2).max(axis=(3, 5))             # pool 2x2
    y = jax.lax.conv_general_dilated(
        y, raw["conv2_w"], window_strides=(1, 1), padding="VALID",
        dimension_numbers=("NCHW", "OIHW", "NCHW"), precision=prec)
    y = jax.nn.relu(y + raw["conv2_b"].reshape(1, 16, 1, 1))
    y = y.reshape(B, 16, 4, 2, 4, 2).max(axis=(3, 5))              # pool 2x2
    flat = y.reshape(B, -1)                                        # (C,H,W) order
    h = jax.nn.relu(jnp.dot(flat, raw["fc1_w"].T, precision=prec) + raw["fc1_b"])
    return jnp.dot(h, raw["fc2_w"].T, precision=prec) + raw["fc2_b"]


# ----------------------------------- main ------------------------------------


if __name__ == "__main__":
    key = jax.random.PRNGKey(0)
    pkey, xkey = jax.random.split(key)
    raw = init_raw_params(pkey)
    params = build_kernel_params(raw)

    B = 4   # batch grid demo; each image follows the module's batch-1 semantics
    x = jax.random.normal(xkey, (B, 1, 28, 28), dtype=jnp.float32)

    fwd = jax.jit(functools.partial(net_forward, params=params))
    out = fwd(x)
    jax.block_until_ready(out)
    assert out.shape == (B, 3)
    assert bool(jnp.all(jnp.isfinite(out)))

    # Correctness: fused-kernel logits vs plain-XLA reference of the same net.
    # Tolerance tightened from 2e-2 -> 1e-3 (all-f32 kernel, expected ~1e-5;
    # 1e-3 still exposes any column-permutation bug by orders of magnitude).
    logits_k = jax.jit(functools.partial(net_logits, params=params))(x)
    logits_r = jax.jit(functools.partial(reference_logits, raw=raw))(x)
    np.testing.assert_allclose(np.asarray(logits_k), np.asarray(logits_r),
                               rtol=1e-3, atol=1e-3)

    print("KERNEL_OK")
</pallas_src>

<mosaic_0001>
module attributes {stable_mosaic.version = 11 : i64} {
  func.func @_net_kernel(%arg0: i32, %arg1: memref<1x28x28xf32, #tpu.memory_space<vmem>>, %arg2: memref<5x28x144xf32, #tpu.memory_space<vmem>>, %arg3: memref<24x24xf32, #tpu.memory_space<vmem>>, %arg4: memref<5x72x128xf32, #tpu.memory_space<vmem>>, %arg5: memref<8x8xf32, #tpu.memory_space<vmem>>, %arg6: memref<4x64x64xf32, #tpu.memory_space<vmem>>, %arg7: memref<64x128xf32, #tpu.memory_space<vmem>>, %arg8: memref<4x256xf32, #tpu.memory_space<vmem>>, %arg9: memref<1x8x128xf32, #tpu.memory_space<vmem>>) attributes {dimension_semantics = [#tpu.dimension_semantics<parallel>], iteration_bounds = array<i64: 4>, scalar_prefetch = 0 : i64, scratch_operands = 0 : i64, tpu.core_type = #tpu.core_type<tc>, window_params = [{transform_indices = @transform_0, window_bounds = array<i64: 1, 28, 28>}, {pipeline_mode = #tpu.pipeline_mode<synchronous>, transform_indices = @transform_1, window_bounds = array<i64: 5, 28, 144>}, {pipeline_mode = #tpu.pipeline_mode<synchronous>, transform_indices = @transform_2, window_bounds = array<i64: 24, 24>}, {pipeline_mode = #tpu.pipeline_mode<synchronous>, transform_indices = @transform_3, window_bounds = array<i64: 5, 72, 128>}, {pipeline_mode = #tpu.pipeline_mode<synchronous>, transform_indices = @transform_4, window_bounds = array<i64: 8, 8>}, {pipeline_mode = #tpu.pipeline_mode<synchronous>, transform_indices = @transform_5, window_bounds = array<i64: 4, 64, 64>}, {pipeline_mode = #tpu.pipeline_mode<synchronous>, transform_indices = @transform_6, window_bounds = array<i64: 64, 128>}, {pipeline_mode = #tpu.pipeline_mode<synchronous>, transform_indices = @transform_7, window_bounds = array<i64: 4, 256>}, {transform_indices = @transform_8, window_bounds = array<i64: 1, 8, 128>}]} {
    %c0 = arith.constant 0 : index
    %c0_0 = arith.constant 0 : index
    %c0_1 = arith.constant 0 : index
    %0 = vector.load %arg1[%c0, %c0_0, %c0_1] : memref<1x28x28xf32, #tpu.memory_space<vmem>>, vector<1x28x28xf32>
    %1 = vector.shape_cast %0 : vector<1x28x28xf32> to vector<28x28xf32>
    %c0_2 = arith.constant 0 : index
    %c0_3 = arith.constant 0 : index
    %2 = vector.load %arg8[%c0_2, %c0_3] : memref<4x256xf32, #tpu.memory_space<vmem>>, vector<4x256xf32>
    %3 = vector.extract_strided_slice %2 {offsets = [0, 0], sizes = [1, 144], strides = [1, 1]} : vector<4x256xf32> to vector<1x144xf32>
    %4 = vector.extract_strided_slice %2 {offsets = [1, 0], sizes = [1, 128], strides = [1, 1]} : vector<4x256xf32> to vector<1x128xf32>
    %5 = vector.extract_strided_slice %2 {offsets = [2, 0], sizes = [1, 64], strides = [1, 1]} : vector<4x256xf32> to vector<1x64xf32>
    %6 = vector.extract_strided_slice %2 {offsets = [3, 0], sizes = [1, 128], strides = [1, 1]} : vector<4x256xf32> to vector<1x128xf32>
    %7 = vector.extract_strided_slice %1 {offsets = [0, 0], sizes = [24, 28], strides = [1, 1]} : vector<28x28xf32> to vector<24x28xf32>
    %c0_4 = arith.constant 0 : index
    %c0_5 = arith.constant 0 : index
    %c0_6 = arith.constant 0 : index
    %8 = vector.load %arg2[%c0_4, %c0_5, %c0_6] : memref<5x28x144xf32, #tpu.memory_space<vmem>>, vector<1x28x144xf32>
    %9 = vector.shape_cast %8 : vector<1x28x144xf32> to vector<28x144xf32>
    %cst = arith.constant dense<0.000000e+00> : vector<24x144xf32>
    %10 = tpu.matmul %7, %9, %cst {dimension_numbers = #tpu.dot_dimension_numbers<[1], [0], [0], [1], [0, 0, 1, 1], [], []>} : vector<24x28xf32>, vector<28x144xf32>, vector<24x144xf32> -> vector<24x144xf32>
    %11 = vector.extract_strided_slice %1 {offsets = [1, 0], sizes = [24, 28], strides = [1, 1]} : vector<28x28xf32> to vector<24x28xf32>
    %c1 = arith.constant 1 : index
    %c0_7 = arith.constant 0 : index
    %c0_8 = arith.constant 0 : index
    %12 = vector.load %arg2[%c1, %c0_7, %c0_8] : memref<5x28x144xf32, #tpu.memory_space<vmem>>, vector<1x28x144xf32>
    %13 = vector.shape_cast %12 : vector<1x28x144xf32> to vector<28x144xf32>
    %cst_9 = arith.constant dense<0.000000e+00> : vector<24x144xf32>
    %14 = tpu.matmul %11, %13, %cst_9 {dimension_numbers = #tpu.dot_dimension_numbers<[1], [0], [0], [1], [0, 0, 1, 1], [], []>} : vector<24x28xf32>, vector<28x144xf32>, vector<24x144xf32> -> vector<24x144xf32>
    %15 = vector.extract_strided_slice %1 {offsets = [2, 0], sizes = [24, 28], strides = [1, 1]} : vector<28x28xf32> to vector<24x28xf32>
    %c2 = arith.constant 2 : index
    %c0_10 = arith.constant 0 : index
    %c0_11 = arith.constant 0 : index
    %16 = vector.load %arg2[%c2, %c0_10, %c0_11] : memref<5x28x144xf32, #tpu.memory_space<vmem>>, vector<1x28x144xf32>
    %17 = vector.shape_cast %16 : vector<1x28x144xf32> to vector<28x144xf32>
    %cst_12 = arith.constant dense<0.000000e+00> : vector<24x144xf32>
    %18 = tpu.matmul %15, %17, %cst_12 {dimension_numbers = #tpu.dot_dimension_numbers<[1], [0], [0], [1], [0, 0, 1, 1], [], []>} : vector<24x28xf32>, vector<28x144xf32>, vector<24x144xf32> -> vector<24x144xf32>
    %19 = vector.extract_strided_slice %1 {offsets = [3, 0], sizes = [24, 28], strides = [1, 1]} : vector<28x28xf32> to vector<24x28xf32>
    %c3 = arith.constant 3 : index
    %c0_13 = arith.constant 0 : index
    %c0_14 = arith.constant 0 : index
    %20 = vector.load %arg2[%c3, %c0_13, %c0_14] : memref<5x28x144xf32, #tpu.memory_space<vmem>>, vector<1x28x144xf32>
    %21 = vector.shape_cast %20 : vector<1x28x144xf32> to vector<28x144xf32>
    %cst_15 = arith.constant dense<0.000000e+00> : vector<24x144xf32>
    %22 = tpu.matmul %19, %21, %cst_15 {dimension_numbers = #tpu.dot_dimension_numbers<[1], [0], [0], [1], [0, 0, 1, 1], [], []>} : vector<24x28xf32>, vector<28x144xf32>, vector<24x144xf32> -> vector<24x144xf32>
    %23 = vector.extract_strided_slice %1 {offsets = [4, 0], sizes = [24, 28], strides = [1, 1]} : vector<28x28xf32> to vector<24x28xf32>
    %c4 = arith.constant 4 : index
    %c0_16 = arith.constant 0 : index
    %c0_17 = arith.constant 0 : index
    %24 = vector.load %arg2[%c4, %c0_16, %c0_17] : memref<5x28x144xf32, #tpu.memory_space<vmem>>, vector<1x28x144xf32>
    %25 = vector.shape_cast %24 : vector<1x28x144xf32> to vector<28x144xf32>
    %cst_18 = arith.constant dense<0.000000e+00> : vector<24x144xf32>
    %26 = tpu.matmul %23, %25, %cst_18 {dimension_numbers = #tpu.dot_dimension_numbers<[1], [0], [0], [1], [0, 0, 1, 1], [], []>} : vector<24x28xf32>, vector<28x144xf32>, vector<24x144xf32> -> vector<24x144xf32>
    %27 = arith.addf %10, %14 : vector<24x144xf32>
    %28 = arith.addf %18, %22 : vector<24x144xf32>
    %29 = arith.addf %27, %28 : vector<24x144xf32>
    %30 = arith.addf %29, %26 : vector<24x144xf32>
    %31 = vector.broadcast %3 : vector<1x144xf32> to vector<24x144xf32>
    %32 = arith.addf %30, %31 : vector<24x144xf32>
    %cst_19 = arith.constant 0.000000e+00 : f32
    %33 = vector.broadcast %cst_19 : f32 to vector<24x144xf32>
    %34 = arith.maximumf %32, %33 : vector<24x144xf32>
    %35 = vector.extract_strided_slice %34 {offsets = [0, 0], sizes = [24, 72], strides = [1, 1]} : vector<24x144xf32> to vector<24x72xf32>
    %36 = vector.extract_strided_slice %34 {offsets = [0, 72], sizes = [24, 72], strides = [1, 1]} : vector<24x144xf32> to vector<24x72xf32>
    %37 = arith.maximumf %35, %36 : vector<24x72xf32>
    %c0_20 = arith.constant 0 : index
    %c0_21 = arith.constant 0 : index
    %38 = vector.load %arg3[%c0_20, %c0_21] : memref<24x24xf32, #tpu.memory_space<vmem>>, vector<24x24xf32>
    %cst_22 = arith.constant dense<0.000000e+00> : vector<24x72xf32>
    %39 = tpu.matmul %38, %37, %cst_22 {dimension_numbers = #tpu.dot_dimension_numbers<[1], [0], [0], [1], [0, 0, 1, 1], [], []>} : vector<24x24xf32>, vector<24x72xf32>, vector<24x72xf32> -> vector<24x72xf32>
    %40 = vector.extract_strided_slice %39 {offsets = [0, 0], sizes = [12, 72], strides = [1, 1]} : vector<24x72xf32> to vector<12x72xf32>
    %41 = vector.extract_strided_slice %39 {offsets = [12, 0], sizes = [12, 72], strides = [1, 1]} : vector<24x72xf32> to vector<12x72xf32>
    %42 = arith.maximumf %40, %41 : vector<12x72xf32>
    %43 = vector.extract_strided_slice %42 {offsets = [0, 0], sizes = [8, 72], strides = [1, 1]} : vector<12x72xf32> to vector<8x72xf32>
    %c0_23 = arith.constant 0 : index
    %c0_24 = arith.constant 0 : index
    %c0_25 = arith.constant 0 : index
    %44 = vector.load %arg4[%c0_23, %c0_24, %c0_25] : memref<5x72x128xf32, #tpu.memory_space<vmem>>, vector<1x72x128xf32>
    %45 = vector.shape_cast %44 : vector<1x72x128xf32> to vector<72x128xf32>
    %cst_26 = arith.constant dense<0.000000e+00> : vector<8x128xf32>
    %46 = tpu.matmul %43, %45, %cst_26 {dimension_numbers = #tpu.dot_dimension_numbers<[1], [0], [0], [1], [0, 0, 1, 1], [], []>} : vector<8x72xf32>, vector<72x128xf32>, vector<8x128xf32> -> vector<8x128xf32>
    %47 = vector.extract_strided_slice %42 {offsets = [1, 0], sizes = [8, 72], strides = [1, 1]} : vector<12x72xf32> to vector<8x72xf32>
    %c1_27 = arith.constant 1 : index
    %c0_28 = arith.constant 0 : index
    %c0_29 = arith.constant 0 : index
    %48 = vector.load %arg4[%c1_27, %c0_28, %c0_29] : memref<5x72x128xf32, #tpu.memory_space<vmem>>, vector<1x72x128xf32>
    %49 = vector.shape_cast %48 : vector<1x72x128xf32> to vector<72x128xf32>
    %cst_30 = arith.constant dense<0.000000e+00> : vector<8x128xf32>
    %50 = tpu.matmul %47, %49, %cst_30 {dimension_numbers = #tpu.dot_dimension_numbers<[1], [0], [0], [1], [0, 0, 1, 1], [], []>} : vector<8x72xf32>, vector<72x128xf32>, vector<8x128xf32> -> vector<8x128xf32>
    %51 = vector.extract_strided_slice %42 {offsets = [2, 0], sizes = [8, 72], strides = [1, 1]} : vector<12x72xf32> to vector<8x72xf32>
    %c2_31 = arith.constant 2 : index
    %c0_32 = arith.constant 0 : index
    %c0_33 = arith.constant 0 : index
    %52 = vector.load %arg4[%c2_31, %c0_32, %c0_33] : memref<5x72x128xf32, #tpu.memory_space<vmem>>, vector<1x72x128xf32>
    %53 = vector.shape_cast %52 : vector<1x72x128xf32> to vector<72x128xf32>
    %cst_34 = arith.constant dense<0.000000e+00> : vector<8x128xf32>
    %54 = tpu.matmul %51, %53, %cst_34 {dimension_numbers = #tpu.dot_dimension_numbers<[1], [0], [0], [1], [0, 0, 1, 1], [], []>} : vector<8x72xf32>, vector<72x128xf32>, vector<8x128xf32> -> vector<8x128xf32>
    %55 = vector.extract_strided_slice %42 {offsets = [3, 0], sizes = [8, 72], strides = [1, 1]} : vector<12x72xf32> to vector<8x72xf32>
    %c3_35 = arith.constant 3 : index
    %c0_36 = arith.constant 0 : index
    %c0_37 = arith.constant 0 : index
    %56 = vector.load %arg4[%c3_35, %c0_36, %c0_37] : memref<5x72x128xf32, #tpu.memory_space<vmem>>, vector<1x72x128xf32>
    %57 = vector.shape_cast %56 : vector<1x72x128xf32> to vector<72x128xf32>
    %cst_38 = arith.constant dense<0.000000e+00> : vector<8x128xf32>
    %58 = tpu.matmul %55, %57, %cst_38 {dimension_numbers = #tpu.dot_dimension_numbers<[1], [0], [0], [1], [0, 0, 1, 1], [], []>} : vector<8x72xf32>, vector<72x128xf32>, vector<8x128xf32> -> vector<8x128xf32>
    %59 = vector.extract_strided_slice %42 {offsets = [4, 0], sizes = [8, 72], strides = [1, 1]} : vector<12x72xf32> to vector<8x72xf32>
    %c4_39 = arith.constant 4 : index
    %c0_40 = arith.constant 0 : index
    %c0_41 = arith.constant 0 : index
    %60 = vector.load %arg4[%c4_39, %c0_40, %c0_41] : memref<5x72x128xf32, #tpu.memory_space<vmem>>, vector<1x72x128xf32>
    %61 = vector.shape_cast %60 : vector<1x72x128xf32> to vector<72x128xf32>
    %cst_42 = arith.constant dense<0.000000e+00> : vector<8x128xf32>
    %62 = tpu.matmul %59, %61, %cst_42 {dimension_numbers = #tpu.dot_dimension_numbers<[1], [0], [0], [1], [0, 0, 1, 1], [], []>} : vector<8x72xf32>, vector<72x128xf32>, vector<8x128xf32> -> vector<8x128xf32>
    %63 = arith.addf %46, %50 : vector<8x128xf32>
    %64 = arith.addf %54, %58 : vector<8x128xf32>
    %65 = arith.addf %63, %64 : vector<8x128xf32>
    %66 = arith.addf %65, %62 : vector<8x128xf32>
    %67 = vector.broadcast %4 : vector<1x128xf32> to vector<8x128xf32>
    %68 = arith.addf %66, %67 : vector<8x128xf32>
    %cst_43 = arith.constant 0.000000e+00 : f32
    %69 = vector.broadcast %cst_43 : f32 to vector<8x128xf32>
    %70 = arith.maximumf %68, %69 : vector<8x128xf32>
    %71 = vector.extract_strided_slice %70 {offsets = [0, 0], sizes = [8, 64], strides = [1, 1]} : vector<8x128xf32> to vector<8x64xf32>
    %72 = vector.extract_strided_slice %70 {offsets = [0, 64], sizes = [8, 64], strides = [1, 1]} : vector<8x128xf32> to vector<8x64xf32>
    %73 = arith.maximumf %71, %72 : vector<8x64xf32>
    %c0_44 = arith.constant 0 : index
    %c0_45 = arith.constant 0 : index
    %74 = vector.load %arg5[%c0_44, %c0_45] : memref<8x8xf32, #tpu.memory_space<vmem>>, vector<8x8xf32>
    %cst_46 = arith.constant dense<0.000000e+00> : vector<8x64xf32>
    %75 = tpu.matmul %74, %73, %cst_46 {dimension_numbers = #tpu.dot_dimension_numbers<[1], [0], [0], [1], [0, 0, 1, 1], [], []>} : vector<8x8xf32>, vector<8x64xf32>, vector<8x64xf32> -> vector<8x64xf32>
    %76 = vector.extract_strided_slice %75 {offsets = [0, 0], sizes = [4, 64], strides = [1, 1]} : vector<8x64xf32> to vector<4x64xf32>
    %77 = vector.extract_strided_slice %75 {offsets = [4, 0], sizes = [4, 64], strides = [1, 1]} : vector<8x64xf32> to vector<4x64xf32>
    %78 = arith.maximumf %76, %77 : vector<4x64xf32>
    %79 = vector.extract_strided_slice %78 {offsets = [0, 0], sizes = [1, 64], strides = [1, 1]} : vector<4x64xf32> to vector<1x64xf32>
    %c0_47 = arith.constant 0 : index
    %c0_48 = arith.constant 0 : index
    %c0_49 = arith.constant 0 : index
    %80 = vector.load %arg6[%c0_47, %c0_48, %c0_49] : memref<4x64x64xf32, #tpu.memory_space<vmem>>, vector<1x64x64xf32>
    %81 = vector.shape_cast %80 : vector<1x64x64xf32> to vector<64x64xf32>
    %cst_50 = arith.constant dense<0.000000e+00> : vector<1x64xf32>
    %82 = tpu.matmul %79, %81, %cst_50 {dimension_numbers = #tpu.dot_dimension_numbers<[1], [0], [0], [1], [0, 0, 1, 1], [], []>} : vector<1x64xf32>, vector<64x64xf32>, vector<1x64xf32> -> vector<1x64xf32>
    %83 = vector.extract_strided_slice %78 {offsets = [1, 0], sizes = [1, 64], strides = [1, 1]} : vector<4x64xf32> to vector<1x64xf32>
    %c1_51 = arith.constant 1 : index
    %c0_52 = arith.constant 0 : index
    %c0_53 = arith.constant 0 : index
    %84 = vector.load %arg6[%c1_51, %c0_52, %c0_53] : memref<4x64x64xf32, #tpu.memory_space<vmem>>, vector<1x64x64xf32>
    %85 = vector.shape_cast %84 : vector<1x64x64xf32> to vector<64x64xf32>
    %cst_54 = arith.constant dense<0.000000e+00> : vector<1x64xf32>
    %86 = tpu.matmul %83, %85, %cst_54 {dimension_numbers = #tpu.dot_dimension_numbers<[1], [0], [0], [1], [0, 0, 1, 1], [], []>} : vector<1x64xf32>, vector<64x64xf32>, vector<1x64xf32> -> vector<1x64xf32>
    %87 = vector.extract_strided_slice %78 {offsets = [2, 0], sizes = [1, 64], strides = [1, 1]} : vector<4x64xf32> to vector<1x64xf32>
    %c2_55 = arith.constant 2 : index
    %c0_56 = arith.constant 0 : index
    %c0_57 = arith.constant 0 : index
    %88 = vector.load %arg6[%c2_55, %c0_56, %c0_57] : memref<4x64x64xf32, #tpu.memory_space<vmem>>, vector<1x64x64xf32>
    %89 = vector.shape_cast %88 : vector<1x64x64xf32> to vector<64x64xf32>
    %cst_58 = arith.constant dense<0.000000e+00> : vector<1x64xf32>
    %90 = tpu.matmul %87, %89, %cst_58 {dimension_numbers = #tpu.dot_dimension_numbers<[1], [0], [0], [1], [0, 0, 1, 1], [], []>} : vector<1x64xf32>, vector<64x64xf32>, vector<1x64xf32> -> vector<1x64xf32>
    %91 = vector.extract_strided_slice %78 {offsets = [3, 0], sizes = [1, 64], strides = [1, 1]} : vector<4x64xf32> to vector<1x64xf32>
    %c3_59 = arith.constant 3 : index
    %c0_60 = arith.constant 0 : index
    %c0_61 = arith.constant 0 : index
    %92 = vector.load %arg6[%c3_59, %c0_60, %c0_61] : memref<4x64x64xf32, #tpu.memory_space<vmem>>, vector<1x64x64xf32>
    %93 = vector.shape_cast %92 : vector<1x64x64xf32> to vector<64x64xf32>
    %cst_62 = arith.constant dense<0.000000e+00> : vector<1x64xf32>
    %94 = tpu.matmul %91, %93, %cst_62 {dimension_numbers = #tpu.dot_dimension_numbers<[1], [0], [0], [1], [0, 0, 1, 1], [], []>} : vector<1x64xf32>, vector<64x64xf32>, vector<1x64xf32> -> vector<1x64xf32>
    %95 = arith.addf %82, %86 : vector<1x64xf32>
    %96 = arith.addf %90, %94 : vector<1x64xf32>
    %97 = arith.addf %95, %96 : vector<1x64xf32>
    %98 = arith.addf %97, %5 : vector<1x64xf32>
    %cst_63 = arith.constant 0.000000e+00 : f32
    %99 = vector.broadcast %cst_63 : f32 to vector<1x64xf32>
    %100 = arith.maximumf %98, %99 : vector<1x64xf32>
    %c0_64 = arith.constant 0 : index
    %c0_65 = arith.constant 0 : index
    %101 = vector.load %arg7[%c0_64, %c0_65] : memref<64x128xf32, #tpu.memory_space<vmem>>, vector<64x128xf32>
    %cst_66 = arith.constant dense<0.000000e+00> : vector<1x128xf32>
    %102 = tpu.matmul %100, %101, %cst_66 {dimension_numbers = #tpu.dot_dimension_numbers<[1], [0], [0], [1], [0, 0, 1, 1], [], []>} : vector<1x64xf32>, vector<64x128xf32>, vector<1x128xf32> -> vector<1x128xf32>
    %103 = arith.addf %102, %6 : vector<1x128xf32>
    %104 = vector.shape_cast %103 : vector<1x128xf32> to vector<1x128xf32>
    %105 = vector.broadcast %104 : vector<1x128xf32> to vector<8x128xf32>
    %c0_67 = arith.constant 0 : index
    %c0_68 = arith.constant 0 : index
    %c0_69 = arith.constant 0 : index
    %106 = vector.load %arg9[%c0_67, %c0_68, %c0_69] : memref<1x8x128xf32, #tpu.memory_space<vmem>>, vector<1x8x128xf32>
    %107 = vector.shape_cast %106 : vector<1x8x128xf32> to vector<8x128xf32>
    %108 = vector.shape_cast %105 : vector<8x128xf32> to vector<1x8x128xf32>
    tpu.vector_store %arg9[%c0_67, %c0_68, %c0_69], %108 {strides = array<i32>} : memref<1x8x128xf32, #tpu.memory_space<vmem>>, vector<1x8x128xf32>,
    return
  }
  func.func @transform_0(%arg0: i32) -> (i32, i32, i32) {
    %c0_i32 = arith.constant 0 : i32
    %c0_i32_0 = arith.constant 0 : i32
    %c0_i32_1 = arith.constant 0 : i32
    return %arg0, %c0_i32, %c0_i32_0 : i32, i32, i32
  }
  func.func @transform_1(%arg0: i32) -> (i32, i32, i32) {
    %c0_i32 = arith.constant 0 : i32
    %c0_i32_0 = arith.constant 0 : i32
    %c0_i32_1 = arith.constant 0 : i32
    %c0_i32_2 = arith.constant 0 : i32
    return %c0_i32, %c0_i32_0, %c0_i32_1 : i32, i32, i32
  }
  func.func @transform_2(%arg0: i32) -> (i32, i32) {
    %c0_i32 = arith.constant 0 : i32
    %c0_i32_0 = arith.constant 0 : i32
    %c0_i32_1 = arith.constant 0 : i32
    return %c0_i32, %c0_i32_0 : i32, i32
  }
  func.func @transform_3(%arg0: i32) -> (i32, i32, i32) {
    %c0_i32 = arith.constant 0 : i32
    %c0_i32_0 = arith.constant 0 : i32
    %c0_i32_1 = arith.constant 0 : i32
    %c0_i32_2 = arith.constant 0 : i32
    return %c0_i32, %c0_i32_0, %c0_i32_1 : i32, i32, i32
  }
  func.func @transform_4(%arg0: i32) -> (i32, i32) {
    %c0_i32 = arith.constant 0 : i32
    %c0_i32_0 = arith.constant 0 : i32
    %c0_i32_1 = arith.constant 0 : i32
    return %c0_i32, %c0_i32_0 : i32, i32
  }
  func.func @transform_5(%arg0: i32) -> (i32, i32, i32) {
    %c0_i32 = arith.constant 0 : i32
    %c0_i32_0 = arith.constant 0 : i32
    %c0_i32_1 = arith.constant 0 : i32
    %c0_i32_2 = arith.constant 0 : i32
    return %c0_i32, %c0_i32_0, %c0_i32_1 : i32, i32, i32
  }
  func.func @transform_6(%arg0: i32) -> (i32, i32) {
    %c0_i32 = arith.constant 0 : i32
    %c0_i32_0 = arith.constant 0 : i32
    %c0_i32_1 = arith.constant 0 : i32
    return %c0_i32, %c0_i32_0 : i32, i32
  }
  func.func @transform_7(%arg0: i32) -> (i32, i32) {
    %c0_i32 = arith.constant 0 : i32
    %c0_i32_0 = arith.constant 0 : i32
    %c0_i32_1 = arith.constant 0 : i32
    return %c0_i32, %c0_i32_0 : i32, i32
  }
  func.func @transform_8(%arg0: i32) -> (i32, i32, i32) {
    %c0_i32 = arith.constant 0 : i32
    %c0_i32_0 = arith.constant 0 : i32
    %c0_i32_1 = arith.constant 0 : i32
    return %arg0, %c0_i32, %c0_i32_0 : i32, i32, i32
  }
}

</mosaic_0001>

<bundles_post_ra>
// kernel: net_forward.1
= control target key start
LH: loop header
LB: loop body
LE: loop exit
PB: predicated region body
PF: predicated region fallthrough
CT: control target
= control target key end

     0   :  { %13 = vsyncpa [#allocation3], 0  ;;  %s3367_s0 = inlined_call_operand.vmem [shape: f32[4,28,28], index: 0, kind: input, shape index: {}]   ;;  %s3368_s1 = inlined_call_operand.hbm [shape: f32[5,28,144], index: 1, kind: input, shape index: {}]   ;;  %s3369_s2 = inlined_call_operand.vmem [shape: f32[24,24], index: 2, kind: input, shape index: {}]   ;;  %s3370_s3 = inlined_call_operand.vmem [shape: f32[5,72,128], index: 3, kind: input, shape index: {}]   ;;  %s3371_s4 = inlined_call_operand.vmem [shape: f32[8,8], index: 4, kind: input, shape index: {}]   ;;  %s3372_s5 = inlined_call_operand.hbm [shape: f32[4,64,64], index: 5, kind: input, shape index: {}]   ;;  %s3373_s6 = inlined_call_operand.vmem [shape: f32[64,128], index: 6, kind: input, shape index: {}]   ;;  %s3374_s7 = inlined_call_operand.vmem [shape: f32[4,256], index: 7, kind: input, shape index: {}]   ;;  %s3375_s8 = inlined_call_operand.vmem [shape: f32[4,8,128], index: 8, kind: output, shape index: {}]  }
   0x1   :  { %14 = vsyncpa [#allocation5], 0  ;;  %s2878_s27 = smov 0  }
   0x2 LB: > { %s2821_s28 = smov [#allocation2]   ;;  %s2884_s30 = sadd.s32 4294967295, %s2819_s27   ;;  %s2819_s27 = sphi %s2878_s27, %s20_s27  }
   0x3   : > { %s236_s29 = sshll.u32 %s2821_s28, 4  ;;  %p2088_p0 = scmp.ge.s32.totalorder %s2819_s27, 1  ;;  %s237_s29 = int_to_ptr.vmem [resolvable:$true] %s236_s29 }
   0x4   : > { %p224_p1 = scmp.lt.s32.totalorder %s2819_s27, 5  ;;  %p3376_p3 = scmp.eq.s32.totalorder %s2884_s30, 0 }
   0x5   : > { %s2822_s10 = smov [#allocation4]   ;;  %s2749_s15 = scalar_lea.hbm %s3368_s1, 5120 }
   0x6   : > { %p2888_p2 = pnand %p2088_p0, %p224_p1  ;;  %s258_s11 = sshll.u32 %s2822_s10, 4  ;;  %s2901_s11 = int_to_ptr.vmem [resolvable:$true] %s258_s11 }
   0x7   : > { %p2750_p6 = scmp.ne.s32.totalorder %s3368_s1, %s2749_s15  ;;  %p2756_p10 = scmp.lt.u32.totalorder %s2749_s15, %s3368_s1 }
   0x8   : > { %s3378_s9 = scalar_select %p2888_p2, 1, 0 }
   0x9   : > { %p2708_p4 = pneg %p2888_p2 }
   0xb   : > { %p2897_p5 = pnand %p3376_p3, %p2708_p4 }
   0xd   : > { %p2751_p7 = pneg %p2897_p5 }
   0xf   : > { %p2752_p8 = pnand %p2751_p7, %p2750_p6 }
  0x11   : > { %p2753_p9 = pneg %p2752_p8 }
  0x13   : > { %p2758_p11 = pnand %p2756_p10, %p2753_p9 }
  0x15   : > { %2761 = shalt.err (!%p2758_p11)
}
  0x16   : > { %s2762_s20 = scalar_lea.vmem %s237_s29, 5120  ;;  %p2770_p1 = scmp.lt.s32.totalorder %s237_s29, %s237_s29 }
  0x17   : > { %p2763_p12 = scmp.ne.s32.totalorder %s237_s29, %s2762_s20  ;;  %p2771_p4 = scmp.lt.s32.totalorder %s2762_s20, %s2762_s20 }
  0x19   : > { %p2765_p13 = pnand %p2763_p12, %p2751_p7  ;;  %p2772_p3 = por %p2771_p4, %p2770_p1 }
  0x1b   : > { %p2766_p0 = pneg %p2765_p13 }
  0x1d   : > { %p2773_p2 = pnand %p2772_p3, %p2766_p0 }
  0x1f   : > { %2776 = shalt.err (!%p2773_p2)
}
  0x20   : > { %s2823_s21 = smov 256   ;;  %s2824_s22 = smov 16  }
  0x21   : > { %2711 = dma.hbm_to_vmem [thread:$0]  (!%p2897_p5), %s3368_s1, 5120, %s237_s29, [#allocation3], %s2823_s21, %s2823_s21, %s2824_s22  }
  0x22   : > { %s2777_s28 = scalar_lea.hbm %s3372_s5, 4096 }
  0x23   : > { %p2778_p6 = scmp.ne.s32.totalorder %s3372_s5, %s2777_s28  ;;  %p2784_p8 = scmp.lt.u32.totalorder %s2777_s28, %s3372_s5 }
  0x25   : > { %p2780_p2 = pnand %p2778_p6, %p2751_p7 }
  0x27   : > { %p2781_p3 = pneg %p2780_p2 }
  0x29   : > { %p2786_p9 = pnand %p2784_p8, %p2781_p3 }
  0x2b   : > { %2789 = shalt.err (!%p2786_p9)
}
  0x2c   : > { %s2790_s29 = scalar_lea.vmem %s2901_s11, 4096  ;;  %p2798_p13 = scmp.lt.s32.totalorder %s2901_s11, %s2901_s11 }
  0x2d   : > { %p2791_p10 = scmp.ne.s32.totalorder %s2901_s11, %s2790_s29  ;;  %p2799_p0 = scmp.lt.s32.totalorder %s2790_s29, %s2790_s29 }
  0x2f   : > { %p2793_p11 = pnand %p2791_p10, %p2751_p7  ;;  %p2800_p1 = por %p2799_p0, %p2798_p13 }
  0x31   : > { %p2794_p12 = pneg %p2793_p11 }
  0x33   : > { %p2801_p4 = pnand %p2800_p1, %p2794_p12 }
  0x35   : > { %2804 = shalt.err (!%p2801_p4)
}
  0x36   : > { %s2825_s16 = smov 128   ;;  %s2826_s17 = smov 8  }
  0x37   : > { %2714 = dma.hbm_to_vmem [thread:$0]  (!%p2897_p5), %s3372_s5, 4096, %s2901_s11, [#allocation5], %s2825_s16, %s2825_s16, %s2826_s17  }
  0x38   : > { %p3380_p6 = scmp.ne.s32.totalorder %s3378_s9, 0 }
  0x39   : > { %p3381_p7 = scmp.eq.s32.totalorder (!%p3380_p6), %s2884_s30, 0 }
  0x3a   : > { %288 = sbr.rel (%p3380_p6) target bundleno = 1769 (0x6e9), region = 52 }
  0x41   : > { %2810 = dma.done.wait (%p3381_p7), [#allocation3], 5120   ;;  %p3382_p2 = pmov %p3381_p7 }
  0x43   : > { %2812 = vsyncadd (%p3382_p2), [#allocation3], 4294962176  ;;  %p3383_p3 = pmov %p3382_p2 }
  0x44   : > { %p3384_p8 = pmov %p3382_p2 }
  0x45   : > { %2814 = dma.done.wait (%p3383_p3), [#allocation5], 4096  }
  0x46   : > { %2816 = vsyncadd (%p3384_p8), [#allocation5], 4294963200  ;;  %p325_p9 = scmp.lt.s32.totalorder %s2884_s30, 3  ;;  %v2827_v0 = vmov 0.0   ;;  %vm375_vm0 = vcmask 1043456   ;;  %vm2828_vm1 = vmmov 1  }
  0x47   : > { %446 = vmatprep.mubr.f32.mxu0 %v2827_v0  ;;  %458 = vmatprep.mubr.f32.mxu1 %v2827_v0  ;;  %vm2968_vm2 = vmpackc.low %vm375_vm0, %vm2828_vm1  ;;  %v349_v2 = vld [vmem:[#allocation2 + $0x48] sm:$0xff]  ;;  %v351_v3 = vld [vmem:[#allocation2 + $0x58] sm:$0xff]  ;;  %vm360_vm3 = vcmask 1046528   ;;  %vm368_vm4 = vcmask 228352   ;;  %vm483_vm5 = vcmask 1044480   ;;  %vm792_vm6 = vcmask 1045504  }
  0x48   : > { %s3388_s30 = smov (!%p325_p9, %s2884_s30), 3  ;;  %v348_v4 = vld [vmem:[#allocation2 + $0x40] sm:$0xff]  ;;  %v2499_v5 = vpack.c.bf16 %v351_v3, %v349_v2  ;;  %v350_v6 = vld [vmem:[#allocation2 + $0x50] sm:$0xff]  ;;  %v353_v7 = vld [vmem:[#allocation2 + $0x68] sm:$0xff]  ;;  %s2830_s23 = smov 56   ;;  %vm2831_vm7 = vmmov 0  }
  0x49   : > { %s2175_s9 = sshll.u32 %s3388_s30, 5  ;;  %v355_v8 = vld [vmem:[#allocation2 + $0x78] sm:$0xf]  ;;  %v2501_v9 = vpack.c.bf16 %v350_v6, %v348_v4  ;;  %v352_v11 = vld [vmem:[#allocation2 + $0x60] sm:$0xff]  ;;  %v354_v12 = vld [vmem:[#allocation2 + $0x70] sm:$0xf] }
  0x4a   : > { %s2975_s20 = scalar_lea.vmem %s3367_s0, %s2175_s9  ;;  %v2503_v10 = vpack.c.bf16 %v355_v8, %v353_v7  ;;  %2500 = vmatprep.subr.bf16.mxu0 %v2499_v5  ;;  %v476_v15 = vld [vmem:[#allocation2 + $0xc8] sm:$0xff]  ;;  %v478_v16 = vld [vmem:[#allocation2 + $0xd8] sm:$0xff]  ;;  %2672 = vmatprep.subr.bf16.mxu1 %v2499_v5  ;;  %v2506_v17 = vpack.c.bf16 %v354_v12, %v352_v11  ;;  %v475_v21 = vld [vmem:[#allocation2 + $0xc0] sm:$0xff]  ;;  %vm956_vm8 = vcmask 457728   ;;  %vm969_vm9 = vcmask 195584   ;;  %s2097_s12 = sshll.u32 %s3388_s30, 3 }
  0x4b   : > { %v2978_v13 = vld [vmem:[%s2975_s20] sm:$0xff]  ;;  %v2981_v14 = vld [vmem:[%s2975_s20 + $0x8] sm:$0xff]  ;;  %2502 = vmatpush1.bf16.msra.mxu0 %v2501_v9  ;;  %2674 = vmatpush1.bf16.msra.mxu1 %v2501_v9  ;;  %v2509_v20 = vpack.c.bf16 %v478_v16, %v476_v15  ;;  %v477_v22 = vld [vmem:[#allocation2 + $0xd0] sm:$0xff]  ;;  %vm1092_vm10 = vcmask 588800   ;;  %vm1506_vm11 = vcmask 64512   ;;  %vm1603_vm12 = vcmask 523264   ;;  %s333_s22 = scalar_lea.vmem %s3375_s8, %s2097_s12 }
  0x4c   : > { %v361_v18 = vrot.slane %v2978_v13, 1  ;;  %v362_v19 = vrot.slane %v2981_v14, 1  ;;  %2505 = vmatprep.subr.msk.bf16.mxu0 %vm2968_vm2, %v2503_v10  ;;  %v2988_v23 = vld [vmem:[%s2975_s20 + $0x10] sm:$0xff]  ;;  %2673 = vmatprep.subr.msk.bf16.mxu1 %vm2968_vm2, %v2503_v10  ;;  %v480_v24 = vld [vmem:[#allocation2 + $0xe8] sm:$0xff]  ;;  %v482_v25 = vld [vmem:[#allocation2 + $0xf8] sm:$0xf]  ;;  %v2511_v27 = vpack.c.bf16 %v477_v22, %v475_v21 }
  0x4d   : > { %v364_v28 = vrot.slane %v2988_v23, 1  ;;  %v2513_v29 = vpack.c.bf16 %v482_v25, %v480_v24  ;;  %v479_v30 = vld [vmem:[#allocation2 + $0xe0] sm:$0xff]  ;;  %v481_v31 = vld [vmem:[#allocation2 + $0xf0] sm:$0xf]  ;;  %v588_v32 = vld [vmem:[#allocation2 + $0x108] sm:$0xff]  ;;  %v484_v34 = vrot.slane %v2978_v13, 3 }
  0x4e   : > { %v363_v26 = vsel %vm360_vm3, %v361_v18, %v362_v19  ;;  %v590_v33 = vld [vmem:[#allocation2 + $0x118] sm:$0xff]  ;;  %v2516_v37 = vpack.c.bf16 %v481_v31, %v479_v30  ;;  %v485_v38 = vrot.slane %v2981_v14, 3  ;;  %v587_v41 = vld [vmem:[#allocation2 + $0x100] sm:$0xff]  ;;  %v589_v42 = vld [vmem:[#allocation2 + $0x110] sm:$0xff]  ;;  %v487_v48 = vrot.slane %v2988_v23, 3 }
  0x4f   : > { %2508 = vmatpush1.bf16.msk.msra.mxu0 %vm2968_vm2, %v2506_v17  ;;  %2675 = vmatpush1.bf16.msk.msra.mxu1 %vm2968_vm2, %v2506_v17  ;;  %v3001_v35 = vld [vmem:[%s2975_s20 + $0x18] sm:$0xf]  ;;  %v365_v36 = vsel %vm360_vm3, %v362_v19, %v364_v28  ;;  %v2519_v40 = vpack.c.bf16 %v590_v33, %v588_v32  ;;  %v592_v43 = vld [vmem:[#allocation2 + $0x128] sm:$0xff]  ;;  %v2521_v47 = vpack.c.bf16 %v589_v42, %v587_v41  ;;  %v591_v50 = vld [vmem:[#allocation2 + $0x120] sm:$0xff]  ;;  %v595_v59 = vrot.slane %v2978_v13, 4  ;;  %s2832_s20 = smov 64  }
  0x50   : > { %2510 = vmatprep.subr.bf16.mxu0 %v2509_v20  ;;  %v366_v39 = vrot.slane %v3001_v35, 1  ;;  %v594_v44 = vld [vmem:[#allocation2 + $0x138] sm:$0xf]  ;;  %v486_v46 = vsel %vm483_vm5, %v484_v34, %v485_v38  ;;  %v593_v51 = vld [vmem:[#allocation2 + $0x130] sm:$0xf]  ;;  %v340_v52 = vld [vmem:[#allocation2 + $0x8] sm:$0xff]  ;;  %v488_v54 = vsel %vm483_vm5, %v485_v38, %v487_v48  ;;  %v908_v34 = vlaneseq }
  0x51   : > { %v2523_v49 = vpack.c.bf16 %v594_v44, %v592_v43  ;;  %v342_v53 = vld [vmem:[#allocation2 + $0x18] sm:$0xff]  ;;  %v489_v55 = vrot.slane %v3001_v35, 3  ;;  %v2526_v56 = vpack.c.bf16 %v593_v51, %v591_v50  ;;  %v596_v60 = vrot.slane %v2981_v14, 4  ;;  %v339_v61 = vld [vmem:[#allocation2] sm:$0xff]  ;;  %v341_v62 = vld [vmem:[#allocation2 + $0x10] sm:$0xff] }
  0x52   : > { %2100 = vmatmul.mubr.msk.f32.vlgmr.msra.gmra.mrb[0].mxu0 %vm368_vm4, %v363_v26  ;;  %v367_v45 = vsel %vm360_vm3, %v364_v28, %v366_v39  ;;  %v2529_v57 = vpack.c.bf16 %v342_v53, %v340_v52  ;;  %v344_v63 = vld [vmem:[#allocation2 + $0x28] sm:$0xff]  ;;  %v346_v2 = vld [vmem:[#allocation2 + $0x38] sm:$0xf]  ;;  %v2531_v4 = vpack.c.bf16 %v341_v62, %v339_v61  ;;  %v598_v5 = vrot.slane %v2988_v23, 4  ;;  %v343_v7 = vld [vmem:[#allocation2 + $0x20] sm:$0xff] }
  0x53   : > { %2512 = vmatpush1.bf16.msra.mxu0 %v2511_v27  ;;  %452 = vmatprep.mubr.f32.mxu0 %v2827_v0  ;;  %v490_v58 = vsel %vm483_vm5, %v487_v48, %v489_v55  ;;  %v597_v3 = vsel %vm375_vm0, %v595_v59, %v596_v60  ;;  %v2533_v6 = vpack.c.bf16 %v346_v2, %v344_v63  ;;  %v345_v8 = vld [vmem:[#allocation2 + $0x30] sm:$0xf]  ;;  %v467_v9 = vld [vmem:[#allocation2 + $0x88] sm:$0xff]  ;;  %v469_v10 = vld [vmem:[#allocation2 + $0x98] sm:$0xff]  ;;  %v600_v12 = vrot.slane %v3001_v35, 4 }
  0x54   : > { %2515 = vmatprep.subr.msk.bf16.mxu0 %vm2968_vm2, %v2513_v29  ;;  %2102 = vmatmul.mubr.msk.f32.vlgmr.msra.gmra.mrb[0].mxu1 %vm368_vm4, %v367_v45  ;;  %v599_v11 = vsel %vm375_vm0, %v596_v60, %v598_v5  ;;  %v2536_v15 = vpack.c.bf16 %v345_v8, %v343_v7  ;;  %v2539_v16 = vpack.c.bf16 %v469_v10, %v467_v9  ;;  %v466_v18 = vld [vmem:[#allocation2 + $0x80] sm:$0xff]  ;;  %v468_v19 = vld [vmem:[#allocation2 + $0x90] sm:$0xff]  ;;  %v471_v20 = vld [vmem:[#allocation2 + $0xa8] sm:$0xff]  ;;  %v793_v28 = vrot.slane %v2978_v13, 2 }
  0x55   : > { %v601_v17 = vsel %vm375_vm0, %v598_v5, %v600_v12  ;;  %v473_v21 = vld [vmem:[#allocation2 + $0xb8] sm:$0xf]  ;;  %v2541_v22 = vpack.c.bf16 %v468_v19, %v466_v18  ;;  %v470_v25 = vld [vmem:[#allocation2 + $0xa0] sm:$0xff]  ;;  %v472_v26 = vld [vmem:[#allocation2 + $0xb0] sm:$0xf]  ;;  %v794_v29 = vrot.slane %v2981_v14, 2  ;;  %2285 = vmatprep.mubr.msk.f32.mxu1 %vm2831_vm7, %v2827_v0 }
  0x56   : > { %2101 = vmatmul.mubr.msk.f32.gmra.mrb[2].mxu0 %vm368_vm4, %v365_v36  ;;  %v2543_v24 = vpack.c.bf16 %v473_v21, %v471_v20  ;;  %v2546_v27 = vpack.c.bf16 %v472_v26, %v470_v25  ;;  %v796_v31 = vrot.slane %v2988_v23, 2  ;;  %v2126_v21 = vld [vmem:[%s3370_s3 + $0x48] sm:$0xff]  ;;  %v966_v26 = vld [vmem:[%s3369_s2] sm:$0xff] }
  0x57   : > { %2518 = vmatpush1.bf16.msk.msra.mxu0 %vm2968_vm2, %v2516_v37  ;;  %567 = vmatprep.mubr.f32.mxu0 %v2827_v0  ;;  %v795_v30 = vsel %vm792_vm6, %v793_v28, %v794_v29  ;;  %v967_v28 = vld [vmem:[%s3369_s2 + $0x8] sm:$0xff] }
  0x58   : > { %2520 = vmatprep.subr.bf16.mxu0 %v2519_v40  ;;  %v797_v1 = vsel %vm792_vm6, %v794_v29, %v796_v31  ;;  %v968_v29 = vld [vmem:[%s3369_s2 + $0x10] sm:$0xff] }
  0x5a   : > { %2105 = vmatmul.mubr.msk.f32.vlgmr.msra.gmra.mrb[0].mxu0 %vm368_vm4, %v486_v46  ;;  %v2829_v46 = vmov 0.0|0.0  }
  0x5b   : > { %573 = vmatprep.mubr.f32.mxu0 %v2827_v0  ;;  %2522 = vmatpush1.bf16.msra.mxu0 %v2521_v47 }
  0x5c   : > { %2525 = vmatprep.subr.msk.bf16.mxu0 %vm2968_vm2, %v2523_v49  ;;  %2549 = vmatprep.subr.bf16.mxu1 %v2829_v46 }
  0x5e   : > { %2106 = vmatmul.mubr.msk.f32.gmra.mrb[2].mxu0 %vm368_vm4, %v488_v54 }
  0x5f   : > { %579 = vmatprep.mubr.f32.mxu0 %v2827_v0  ;;  %2528 = vmatpush1.bf16.msk.msra.mxu0 %vm2968_vm2, %v2526_v56 }
  0x60   : > { %2530 = vmatprep.subr.bf16.mxu0 %v2529_v57 }
  0x62   : > { %2107 = vmatmul.mubr.msk.f32.gmra.mrb[4].mxu0 %vm368_vm4, %v490_v58 }
  0x63   : > { %678 = vmatprep.mubr.f32.mxu0 %v2827_v0 }
  0x66   : > { %2110 = vmatmul.mubr.msk.f32.vlgmr.msra.gmra.mrb[0].mxu0 %vm368_vm4, %v597_v3  ;;  %v1068_v3 = vld [vmem:[%s3370_s3] sm:$0xff] }
  0x67   : > { %684 = vmatprep.mubr.f32.mxu0 %v2827_v0  ;;  %2532 = vmatpush1.bf16.msra.mxu0 %v2531_v4  ;;  %v1069_v4 = vld [vmem:[%s3370_s3 + $0x8] sm:$0xff] }
  0x68   : > { %2535 = vmatprep.subr.msk.bf16.mxu0 %vm2968_vm2, %v2533_v6  ;;  %v2589_v5 = vpack.c.bf16 %v1069_v4, %v1068_v3 }
  0x6a   : > { %2111 = vmatmul.mubr.msk.f32.gmra.mrb[2].mxu0 %vm368_vm4, %v599_v11 }
  0x6b   : > { %690 = vmatprep.mubr.f32.mxu0 %v2827_v0  ;;  %2538 = vmatpush1.bf16.msk.msra.mxu0 %vm2968_vm2, %v2536_v15 }
  0x6c   : > { %2540 = vmatprep.subr.bf16.mxu0 %v2539_v16 }
  0x6e   : > { %2112 = vmatmul.mubr.msk.f32.gmra.mrb[4].mxu0 %vm368_vm4, %v601_v17 }
  0x6f   : > { %773 = vmatprep.mubr.f32.mxu0 %v2827_v0 }
  0x72   : > { %2115 = vmatmul.mubr.msk.f32.vlgmr.msra.gmra.mrb[0].mxu0 %vm368_vm4, %v2978_v13  ;;  %v798_v13 = vrot.slane %v3001_v35, 2  ;;  %v3080_v35 = vld [vmem:[%s3374_s7] sm:$0xff] }
  0x73   : > { %779 = vmatprep.mubr.f32.mxu0 %v2827_v0  ;;  %2542 = vmatpush1.bf16.msra.mxu0 %v2541_v22  ;;  %v2127_v22 = vld [vmem:[%s3370_s3 + $0x50] sm:$0xff] }
  0x74   : > { %2545 = vmatprep.subr.msk.bf16.mxu0 %vm2968_vm2, %v2543_v24 }
  0x76   : > { %2116 = vmatmul.mubr.msk.f32.gmra.mrb[2].mxu0 %vm368_vm4, %v2981_v14  ;;  %v799_v14 = vsel %vm792_vm6, %v796_v31, %v798_v13  ;;  %v1071_v31 = vld [vmem:[%s3370_s3 + $0x18] sm:$0xff] }
  0x77   : > { %785 = vmatprep.mubr.f32.mxu0 %v2827_v0  ;;  %2548 = vmatpush1.bf16.msk.msra.mxu0 %vm2968_vm2, %v2546_v27  ;;  %v2553_v27 = vpack.c.bf16 %v2127_v22, %v2126_v21  ;;  %v2128_v13 = vld [vmem:[%s3370_s3 + $0x58] sm:$0xff]  ;;  %v2151_v22 = vld [vmem:[%s3370_s3 + $0x108] sm:$0xff] }
  0x78   : > { %2588 = vmatprep.subr.bf16.mxu0 %v2829_v46 }
  0x7a   : > { %2117 = vmatmul.mubr.msk.f32.gmra.mrb[4].mxu0 %vm368_vm4, %v2988_v23  ;;  %v3072_v23 = vshrl.u32 %v908_v34, 7  ;;  %v1073_v34 = vld [vmem:[%s3370_s3 + $0x28] sm:$0xff] }
  0x7b   : > { %876 = vmatprep.mubr.f32.mxu0 %v2827_v0 }
  0x7c   : > { %v3075_v36 = vsub.s32 0, %v3072_v23  ;;  %v914_v37 = vsub.s32 4, %v3072_v23 }
  0x7e   : > { %2120 = vmatmul.mubr.msk.f32.vlgmr.msra.gmra.mrb[0].mxu0 %vm368_vm4, %v795_v30  ;;  %v911_v38 = vrot.slane %v3080_v35, %v3075_v36  ;;  %v915_v39 = vrot.slane %v3080_v35, %v914_v37  ;;  %v1070_v30 = vld [vmem:[%s3370_s3 + $0x10] sm:$0xff] }
  0x7f   : > { %882 = vmatprep.mubr.f32.mxu0 %v2827_v0  ;;  %2590 = vmatpush3.bf16.msra.mxu0 %v2589_v5 }
  0x80   : > { %v921_v40 = vrot.slane %v911_v38, %v3075_v36  ;;  %v925_v41 = vrot.slane %v915_v39, %v3075_v36  ;;  %2591 = vmatprep.subr.bf16.mxu0 %v2829_v46  ;;  %v2130_v38 = vld [vmem:[%s3370_s3 + $0x68] sm:$0xff]  ;;  %v2131_v39 = vld [vmem:[%s3370_s3 + $0x70] sm:$0xff] }
  0x82   : > { %2121 = vmatmul.mubr.msk.f32.gmra.mrb[2].mxu0 %vm368_vm4, %v797_v1  ;;  %v2592_v1 = vpack.c.bf16 %v1071_v31, %v1070_v30  ;;  %v2157_v30 = vld [vmem:[%s3370_s3 + $0x130] sm:$0xff]  ;;  %v2158_v31 = vld [vmem:[%s3370_s3 + $0x138] sm:$0xff] }
  0x83   : > { %888 = vmatprep.mubr.f32.mxu0 %v2827_v0 }
  0x84   : > { %2593 = vmatpush3.bf16.msra.mxu0 %v2592_v1  ;;  %v2580_v1 = vpack.c.bf16 %v2158_v31, %v2157_v30  ;;  %v1597_v30 = vld [vmem:[#allocation4 + $0x60] sm:$0xff]  ;;  %v1598_v31 = vld [vmem:[#allocation4 + $0x68] sm:$0xff] }
  0x85   : > { %2594 = vmatprep.subr.bf16.mxu0 %v2829_v46 }
  0x86   : > { %2122 = vmatmul.mubr.msk.f32.gmra.mrb[4].mxu0 %vm368_vm4, %v799_v14  ;;  %v2129_v14 = vld [vmem:[%s3370_s3 + $0x60] sm:$0xff] }
  0x87   : > { %2375 = vmatprep.mubr.msk.f32.mxu0 %vm2831_vm7, %v2827_v0 }
 0x127   : > { %v460_v32 = vpop.f32.mrb[0].mxu1 }
 0x128   : > { %v462_v33 = vpop.f32.mrb[1].mxu1 }
 0x151   : > { %v878_v42 = vpop.f32.mrb[0].mxu0 }
 0x152   : > { %v926_v43 = vadd.f32 %v921_v40, %v878_v42  ;;  %v880_v44 = vpop.f32.mrb[1].mxu0  ;;  %v1075_v42 = vld [vmem:[%s3370_s3 + $0x38] sm:$0xff] }
 0x153   : > { %v927_v45 = vadd.f32 %v925_v41, %v880_v44  ;;  %v2132_v44 = vld [vmem:[%s3370_s3 + $0x78] sm:$0xff] }
 0x154   : > { %v932_v47 = vmax.f32 %v926_v43, 0.0 }
 0x155   : > { %v933_v48 = vmax.f32 %v927_v45, 0.0  ;;  %v884_v49 = vpop.f32.mrb[2].mxu0  ;;  %v2133_v45 = vld [vmem:[%s3370_s3 + $0x80] sm:$0xff] }
 0x156   : > { %v928_v50 = vadd.f32 %v921_v40, %v884_v49  ;;  %v886_v51 = vpop.f32.mrb[3].mxu0  ;;  %v2134_v49 = vld [vmem:[%s3370_s3 + $0x88] sm:$0xff] }
 0x157   : > { %v929_v52 = vadd.f32 %v925_v41, %v886_v51  ;;  %v2739_v53 = vpack.i.bf16 %v933_v48, %v932_v47  ;;  %v1076_v48 = vld [vmem:[%s3370_s3 + $0x40] sm:$0xff] }
 0x158   : > { %v934_v54 = vmax.f32 %v928_v50, 0.0 }
 0x159   : > { %v935_v55 = vmax.f32 %v929_v52, 0.0  ;;  %2740 = vrot.lane.b32.xlu0 %v2739_v53, %s2830_s23  ;;  %v890_v56 = vpop.f32.mrb[4].mxu0 }
 0x15a   : > { %v2676_v57 = vadd.f32 %v890_v56, %v460_v32  ;;  %v892_v58 = vpop.f32.mrb[5].mxu0  ;;  %v2556_v32 = vpack.c.bf16 %v2129_v14, %v2128_v13  ;;  %v2159_v13 = vld [vmem:[%s3370_s3 + $0x140] sm:$0xff]  ;;  %v2160_v14 = vld [vmem:[%s3370_s3 + $0x148] sm:$0xff] }
 0x15b   : > { %v2744_v59 = vpack.i.bf16 %v935_v55, %v934_v54  ;;  %v2677_v60 = vadd.f32 %v892_v58, %v462_v33  ;;  %v1072_v33 = vld [vmem:[%s3370_s3 + $0x20] sm:$0xff]  ;;  %v2145_v58 = vld [vmem:[%s3370_s3 + $0xd8] sm:$0xff] }
 0x15c   : > { %v930_v61 = vadd.f32 %v2676_v57, %v921_v40  ;;  %v2595_v37 = vpack.c.bf16 %v1073_v34, %v1072_v33  ;;  %v2559_v40 = vpack.c.bf16 %v2131_v39, %v2130_v38  ;;  %v2161_v33 = vld [vmem:[%s3370_s3 + $0x150] sm:$0xff]  ;;  %v2162_v34 = vld [vmem:[%s3370_s3 + $0x158] sm:$0xff] }
 0x15d   : > { %2745 = vrot.lane.b32.xlu0 %v2744_v59, %s2830_s23  ;;  %v931_v62 = vadd.f32 %v2677_v60, %v925_v41  ;;  %v1074_v41 = vld [vmem:[%s3370_s3 + $0x30] sm:$0xff]  ;;  %v2146_v59 = vld [vmem:[%s3370_s3 + $0xe0] sm:$0xff]  ;;  %v2137_v39 = vld [vmem:[%s3370_s3 + $0x98] sm:$0xff] }
 0x15e   : > { %v936_v63 = vmax.f32 %v930_v61, 0.0  ;;  %2596 = vmatpush3.bf16.msra.mxu0 %v2595_v37  ;;  %v2598_v43 = vpack.c.bf16 %v1075_v42, %v1074_v41  ;;  %v2586_v37 = vpack.c.bf16 %v2162_v34, %v2161_v33  ;;  %v2136_v38 = vld [vmem:[%s3370_s3 + $0x90] sm:$0xff]  ;;  %v2138_v42 = vld [vmem:[%s3370_s3 + $0xa0] sm:$0xff]  ;;  %v1693_v34 = vld [vmem:[#allocation4 + $0xf8] sm:$0xff] }
 0x15f   : > { %v937_v2 = vmax.f32 %v931_v62, 0.0  ;;  %2597 = vmatprep.subr.bf16.mxu0 %v2829_v46  ;;  %v2601_v41 = vpack.c.bf16 %v2137_v39, %v2136_v38  ;;  %v1584_v39 = vld [vmem:[#allocation4] sm:$0xff] }
 0x160   : > { %952 = vrot.lane.b32.xlu1 %v936_v63, %s2830_s23 }
 0x162   : > { %2599 = vmatpush3.bf16.msra.mxu0 %v2598_v43  ;;  %v2139_v43 = vld [vmem:[%s3370_s3 + $0xa8] sm:$0xff] }
 0x163   : > { %2373 = vmatprep.subr.mxu0 %v2827_v0 }
 0x164   : > { %954 = vrot.lane.b32.xlu1 %v937_v2, %s2830_s23 }
 0x166   : > { %2374 = vmatpush3.msra.mxu0 %v1076_v48 }
 0x167   : > { %2399 = vmatprep.subr.mxu0 %v2827_v0 }
 0x1cb   : > { %v2741_v6 = vpop.permute.xlu0 %2740 }
 0x1cc   : > { %v2743_v7 = vunpack.i.h.bf16 %v2741_v6  ;;  %v2742_v8 = vunpack.i.l.bf16 %v2741_v6 }
 0x1ce   : > { %v957_v12 = vsel %vm956_vm8, %v2742_v8, %v2743_v7 }
 0x1cf   : > { %v2746_v9 = vpop.permute.xlu0 %2745  ;;  %v963_v17 = vmax.f32 %v932_v47, %v957_v12  ;;  %v2562_v47 = vpack.c.bf16 %v2133_v45, %v2132_v44  ;;  %v2604_v44 = vpack.c.bf16 %v2139_v43, %v2138_v42  ;;  %v2140_v45 = vld [vmem:[%s3370_s3 + $0xb0] sm:$0xff]  ;;  %v1585_v42 = vld [vmem:[#allocation4 + $0x8] sm:$0xff]  ;;  %v1677_v43 = vld [vmem:[#allocation4 + $0x80] sm:$0xff] }
 0x1d0   : > { %v2748_v10 = vunpack.i.h.bf16 %v2746_v9  ;;  %v2747_v11 = vunpack.i.l.bf16 %v2746_v9 }
 0x1d2   : > { %v953_v15 = vpop.permute.xlu1 %952  ;;  %v958_v16 = vsel %vm956_vm8, %v2747_v11, %v2748_v10  ;;  %v2147_v10 = vld [vmem:[%s3370_s3 + $0xe8] sm:$0xff]  ;;  %v2148_v11 = vld [vmem:[%s3370_s3 + $0xf0] sm:$0xff] }
 0x1d3   : > { %v964_v18 = vmax.f32 %v934_v54, %v958_v16 }
 0x1d5   : > { %v2550_v19 = vpack.c.bf16 %v964_v18, %v963_v17  ;;  %v2568_v18 = vpack.c.bf16 %v2148_v11, %v2147_v10  ;;  %v1688_v10 = vld [vmem:[#allocation4 + $0xd0] sm:$0xff]  ;;  %v1689_v11 = vld [vmem:[#allocation4 + $0xd8] sm:$0xff] }
 0x1d6   : > { %v955_v20 = vpop.permute.xlu1 %954 }
 0x1d7   : > { %v959_v24 = vsel %vm956_vm8, %v953_v15, %v955_v20  ;;  %2551 = vmatpush3.bf16.msra.mxu1 %v2550_v19  ;;  %v2149_v19 = vld [vmem:[%s3370_s3 + $0xf8] sm:$0xff]  ;;  %v2150_v20 = vld [vmem:[%s3370_s3 + $0x100] sm:$0xff] }
 0x1d8   : > { %v965_v25 = vmax.f32 %v936_v63, %v959_v24  ;;  %2283 = vmatprep.subr.mxu1 %v2827_v0  ;;  %v2565_v63 = vpack.c.bf16 %v2146_v59, %v2145_v58  ;;  %v2571_v21 = vpack.c.bf16 %v2150_v20, %v2149_v19  ;;  %v2152_v24 = vld [vmem:[%s3370_s3 + $0x110] sm:$0xff]  ;;  %v1593_v20 = vld [vmem:[#allocation4 + $0x40] sm:$0xff] }
 0x1db   : > { %2284 = vmatpush3.msra.mxu1 %v965_v25  ;;  %v2574_v25 = vpack.c.bf16 %v2152_v24, %v2151_v22 }
 0x1dc   : > { %2286 = vmatmul.mubr.msk.f32.vlgmr.msra.gmra.mrb[2].mxu1 %vm969_vm9, %v966_v26  ;;  %2552 = vmatprep.subr.bf16.mxu1 %v2829_v46  ;;  %v2155_v26 = vld [vmem:[%s3370_s3 + $0x120] sm:$0xff] }
 0x1dd   : > { %2288 = vmatprep.mubr.msk.f32.mxu1 %vm2831_vm7, %v2827_v0  ;;  %2554 = vmatpush3.bf16.msra.mxu1 %v2553_v27  ;;  %v2156_v27 = vld [vmem:[%s3370_s3 + $0x128] sm:$0xff] }
 0x1de   : > { %2555 = vmatprep.subr.bf16.mxu1 %v2829_v46 }
 0x1e0   : > { %2289 = vmatmul.mubr.msk.f32.gmra.mrb[4].mxu1 %vm969_vm9, %v967_v28  ;;  %v2153_v28 = vld [vmem:[%s3370_s3 + $0x118] sm:$0xff] }
 0x1e1   : > { %2291 = vmatprep.mubr.msk.f32.mxu1 %vm2831_vm7, %v2827_v0  ;;  %2557 = vmatpush3.bf16.msra.mxu1 %v2556_v32  ;;  %v2583_v32 = vpack.c.bf16 %v2160_v14, %v2159_v13  ;;  %v1599_v13 = vld [vmem:[#allocation4 + $0x70] sm:$0xff]  ;;  %v1600_v14 = vld [vmem:[#allocation4 + $0x78] sm:$0xff] }
 0x1e2   : > { %2558 = vmatprep.subr.bf16.mxu1 %v2829_v46  ;;  %v2622_v33 = vpack.c.bf16 %v1600_v14, %v1599_v13 }
 0x1e4   : > { %2292 = vmatmul.mubr.msk.f32.gmra.mrb[6].mxu1 %vm969_vm9, %v968_v29  ;;  %v2577_v29 = vpack.c.bf16 %v2156_v27, %v2155_v26  ;;  %v1595_v27 = vld [vmem:[#allocation4 + $0x50] sm:$0xff] }
 0x1e5   : > { %2312 = vmatprep.mubr.msk.f32.mxu1 %vm2831_vm7, %v2827_v0  ;;  %2560 = vmatpush3.bf16.msra.mxu1 %v2559_v40  ;;  %v2163_v40 = vld [vmem:[%s3370_s3 + $0x160] sm:$0xff] }
 0x1e6   : > { %2561 = vmatprep.subr.bf16.mxu1 %v2829_v46 }
 0x1e9   : > { %2563 = vmatpush3.bf16.msra.mxu1 %v2562_v47  ;;  %v2141_v47 = vld [vmem:[%s3370_s3 + $0xb8] sm:$0xff] }
 0x1ea   : > { %2310 = vmatprep.subr.mxu1 %v2827_v0  ;;  %v2607_v48 = vpack.c.bf16 %v2141_v47, %v2140_v45  ;;  %v2637_v47 = vpack.c.bf16 %v1585_v42, %v1584_v39 }
 0x1ed   : > { %2311 = vmatpush3.msra.mxu1 %v2134_v49  ;;  %v2142_v49 = vld [vmem:[%s3370_s3 + $0xc0] sm:$0xff] }
 0x1ee   : > { %2564 = vmatprep.subr.bf16.mxu1 %v2829_v46 }
 0x2af   : > { %v1045_v50 = vpop.f32.mrb[2].mxu1 }
 0x2b0   : > { %v2287_v51 = vpop.f32.mrb[3].mxu1 }
 0x2b3   : > { %v1050_v52 = vpop.f32.mrb[4].mxu1 }
 0x2b4   : > { %v2290_v53 = vpop.f32.mrb[5].mxu1  ;;  %v1061_v55 = vrot.slane %v1050_v52, 4 }
 0x2b7   : > { %v1055_v54 = vpop.f32.mrb[6].mxu1 }
 0x2b8   : > { %v1062_v56 = vrot.slane %v1055_v54, 4  ;;  %v2293_v57 = vpop.f32.mrb[7].mxu1 }
 0x2ba   : > { %v1063_v60 = vsel %vm375_vm0, %v1061_v55, %v1062_v56  ;;  %v1067_v61 = vmax.f32 %v1050_v52, %v1062_v56  ;;  %v2144_v52 = vld [vmem:[%s3370_s3 + $0xd0] sm:$0xff] }
 0x2bb   : > { %v1066_v62 = vmax.f32 %v1045_v50, %v1063_v60  ;;  %v2143_v50 = vld [vmem:[%s3370_s3 + $0xc8] sm:$0xff] }
 0x2bc   : > { %v1090_v2 = vrot.slane %v1067_v61, 1  ;;  %v1186_v3 = vrot.slane %v1067_v61, 3  ;;  %v1271_v4 = vrot.slane %v1067_v61, 4  ;;  %v1418_v5 = vrot.slane %v1067_v61, 2 }
 0x2bd   : > { %2376 = vmatmul.mubr.msk.f32.vlgmr.msra.gmra.mrb[6].mxu0 %vm1092_vm10, %v1066_v62  ;;  %v1089_v6 = vrot.slane %v1066_v62, 1  ;;  %v1185_v7 = vrot.slane %v1066_v62, 3  ;;  %v1270_v8 = vrot.slane %v1066_v62, 4  ;;  %v1417_v9 = vrot.slane %v1066_v62, 2 }
 0x2be   : > { %2401 = vmatprep.mubr.msk.f32.mxu0 %vm2831_vm7, %v2827_v0  ;;  %v2610_v51 = vpack.c.bf16 %v2143_v50, %v2142_v49  ;;  %v1496_v62 = vsub.s32 1, %v3072_v23  ;;  %v1586_v49 = vld [vmem:[#allocation4 + $0x10] sm:$0xff] }
 0x2bf   : > { %v1091_v12 = vsel %vm360_vm3, %v1089_v6, %v1090_v2  ;;  %v1187_v15 = vsel %vm483_vm5, %v1185_v7, %v1186_v3  ;;  %v1272_v16 = vsel %vm375_vm0, %v1270_v8, %v1271_v4  ;;  %v3195_v17 = vsel %vm792_vm6, %v1417_v9, %v1418_v5  ;;  %v1686_v4 = vld [vmem:[#allocation4 + $0xc0] sm:$0xff]  ;;  %v1687_v5 = vld [vmem:[#allocation4 + $0xc8] sm:$0xff] }
 0x2c0   : > { %2313 = vmatmul.mubr.msk.f32.vlgmr.msra.gmra.mrb[8].mxu1 %vm1092_vm10, %v1091_v12  ;;  %v1497_v7 = vrot.slane %v3080_v35, %v1496_v62  ;;  %v2625_v8 = vpack.c.bf16 %v1687_v5, %v1686_v4  ;;  %v1684_v4 = vld [vmem:[#allocation4 + $0xb8] sm:$0xff] }
 0x2c1   : > { %2566 = vmatpush3.bf16.msra.mxu1 %v2565_v63  ;;  %2333 = vmatprep.mubr.msk.f32.mxu1 %vm2831_vm7, %v2827_v0 }
 0x2c2   : > { %2567 = vmatprep.subr.bf16.mxu1 %v2829_v46 }
 0x2c5   : > { %2569 = vmatpush3.bf16.msra.mxu1 %v2568_v18  ;;  %v1691_v18 = vld [vmem:[#allocation4 + $0xe8] sm:$0xff] }
 0x2c6   : > { %2570 = vmatprep.subr.bf16.mxu1 %v2829_v46 }
 0x2c9   : > { %2572 = vmatpush3.bf16.msra.mxu1 %v2571_v21  ;;  %v1594_v21 = vld [vmem:[#allocation4 + $0x48] sm:$0xff] }
 0x2ca   : > { %2573 = vmatprep.subr.bf16.mxu1 %v2829_v46  ;;  %v2613_v26 = vpack.c.bf16 %v1594_v21, %v1593_v20 }
 0x2cd   : > { %2575 = vmatpush3.bf16.msra.mxu1 %v2574_v25  ;;  %v1505_v25 = vld [vmem:[%s3371_s4] sm:$0xff] }
 0x2ce   : > { %2331 = vmatprep.subr.mxu1 %v2827_v0 }
 0x2d1   : > { %2332 = vmatpush3.msra.mxu1 %v2153_v28  ;;  %v1596_v28 = vld [vmem:[#allocation4 + $0x58] sm:$0xff] }
 0x2d2   : > { %2334 = vmatmul.mubr.msk.f32.vlgmr.msra.gmra.mrb[10].mxu1 %vm1092_vm10, %v1187_v15  ;;  %2576 = vmatprep.subr.bf16.mxu1 %v2829_v46  ;;  %v2628_v15 = vpack.c.bf16 %v1689_v11, %v1688_v10  ;;  %v1922_v10 = vld [vmem:[%s3373_s6 + $0x10] sm:$0xff] }
 0x2d3   : > { %2578 = vmatpush3.bf16.msra.mxu1 %v2577_v29  ;;  %2354 = vmatprep.mubr.msk.f32.mxu1 %vm2831_vm7, %v2827_v0  ;;  %v2616_v29 = vpack.c.bf16 %v1596_v28, %v1595_v27 }
 0x2d4   : > { %2579 = vmatprep.subr.bf16.mxu1 %v2829_v46 }
 0x2d7   : > { %2581 = vmatpush3.bf16.msra.mxu1 %v2580_v1  ;;  %v2619_v1 = vpack.c.bf16 %v1598_v31, %v1597_v30 }
 0x2d8   : > { %2582 = vmatprep.subr.bf16.mxu1 %v2829_v46 }
 0x2db   : > { %2584 = vmatpush3.bf16.msra.mxu1 %v2583_v32  ;;  %v1692_v32 = vld [vmem:[#allocation4 + $0xf0] sm:$0xff] }
 0x2dc   : > { %2585 = vmatprep.subr.bf16.mxu1 %v2829_v46 }
 0x2df   : > { %2587 = vmatpush3.bf16.msra.mxu1 %v2586_v37  ;;  %v2634_v37 = vpack.c.bf16 %v1693_v34, %v1692_v32 }
 0x2e0   : > { %2352 = vmatprep.subr.mxu1 %v2827_v0 }
 0x2e3   : > { %2353 = vmatpush3.msra.mxu1 %v2163_v40 }
 0x2e4   : > { %2355 = vmatmul.mubr.msk.f32.vlgmr.msra.gmra.mrb[12].mxu1 %vm1092_vm10, %v1272_v16  ;;  %2600 = vmatprep.subr.bf16.mxu1 %v2829_v46 }
 0x2e5   : > { %2602 = vmatpush3.bf16.msra.mxu1 %v2601_v41  ;;  %2396 = vmatprep.mubr.msk.f32.mxu1 %vm2831_vm7, %v2827_v0 }
 0x2e6   : > { %2603 = vmatprep.subr.bf16.mxu1 %v2829_v46 }
 0x2e9   : > { %2605 = vmatpush3.bf16.msra.mxu1 %v2604_v44  ;;  %v1678_v44 = vld [vmem:[#allocation4 + $0x88] sm:$0xff] }
 0x2ea   : > { %2606 = vmatprep.subr.bf16.mxu1 %v2829_v46 }
 0x2ed   : > { %2608 = vmatpush3.bf16.msra.mxu1 %v2607_v48  ;;  %v2649_v48 = vpack.c.bf16 %v1678_v44, %v1677_v43 }
 0x2ee   : > { %2609 = vmatprep.subr.bf16.mxu1 %v2829_v46 }
 0x2f1   : > { %2611 = vmatpush3.bf16.msra.mxu1 %v2610_v51 }
 0x2f2   : > { %2394 = vmatprep.subr.mxu1 %v2827_v0 }
 0x2f5   : > { %2395 = vmatpush3.msra.mxu1 %v2144_v52  ;;  %v1587_v52 = vld [vmem:[#allocation4 + $0x18] sm:$0xff] }
 0x2f6   : > { %2397 = vmatmul.mubr.msk.f32.vlgmr.msra.gmra.mrb[14].mxu1 %vm1092_vm10, %v3195_v17  ;;  %2624 = vmatprep.subr.bf16.mxu1 %v2829_v46  ;;  %v1690_v17 = vld [vmem:[#allocation4 + $0xe0] sm:$0xff] }
 0x2f7   : > { %2439 = vmatprep.mubr.msk.f32.mxu1 %vm2831_vm7, %v2827_v0  ;;  %2626 = vmatpush3.bf16.msra.mxu1 %v2625_v8  ;;  %v2631_v19 = vpack.c.bf16 %v1691_v18, %v1690_v17  ;;  %v1920_v8 = vld [vmem:[%s3373_s6] sm:$0xff]  ;;  %v1926_v18 = vld [vmem:[%s3373_s6 + $0x30] sm:$0xff] }
 0x2f8   : > { %2627 = vmatprep.subr.bf16.mxu1 %v2829_v46 }
 0x2fb   : > { %2629 = vmatpush3.bf16.msra.mxu1 %v2628_v15 }
 0x2fc   : > { %2630 = vmatprep.subr.bf16.mxu1 %v2829_v46 }
 0x2ff   : > { %2632 = vmatpush3.bf16.msra.mxu1 %v2631_v19  ;;  %v1927_v19 = vld [vmem:[%s3373_s6 + $0x38] sm:$0xff] }
 0x300   : > { %2633 = vmatprep.subr.bf16.mxu1 %v2829_v46  ;;  %v2670_v20 = vpack.c.bf16 %v1927_v19, %v1926_v18 }
 0x303   : > { %2635 = vmatpush3.bf16.msra.mxu1 %v2634_v37 }
 0x304   : > { %2648 = vmatprep.subr.bf16.mxu1 %v2829_v46 }
 0x390   : > { %v1413_v53 = vpop.f32.mrb[6].mxu0 }
 0x391   : > { %v2377_v54 = vpop.f32.mrb[7].mxu0 }
 0x392   : > { %v1680_v54 = vld [vmem:[#allocation4 + $0x98] sm:$0xff] }
 0x393   : > { %v1161_v55 = vpop.f32.mrb[8].mxu1 }
 0x394   : > { %v1414_v56 = vadd.f32 %v1413_v53, %v1161_v55  ;;  %v2314_v57 = vpop.f32.mrb[9].mxu1  ;;  %v1679_v53 = vld [vmem:[#allocation4 + $0x90] sm:$0xff]  ;;  %v2640_v55 = vpack.c.bf16 %v1587_v52, %v1586_v49 }
 0x395   : > { %v1588_v57 = vld [vmem:[#allocation4 + $0x20] sm:$0xff] }
 0x3a5   : > { %v1256_v58 = vpop.f32.mrb[10].mxu1 }
 0x3a6   : > { %v2335_v59 = vpop.f32.mrb[11].mxu1 }
 0x3a7   : > { %v1681_v59 = vld [vmem:[#allocation4 + $0xa0] sm:$0xff] }
 0x3b7   : > { %v1341_v60 = vpop.f32.mrb[12].mxu1 }
 0x3b8   : > { %v2356_v61 = vpop.f32.mrb[13].mxu1 }
 0x3c9   : > { %v1488_v63 = vpop.f32.mrb[14].mxu1 }
 0x3ca   : > { %v1489_v2 = vadd.f32 %v1488_v63, %v1256_v58  ;;  %v2398_v3 = vpop.f32.mrb[15].mxu1  ;;  %v1589_v58 = vld [vmem:[#allocation4 + $0x28] sm:$0xff]  ;;  %v1590_v63 = vld [vmem:[#allocation4 + $0x30] sm:$0xff] }
 0x3cb   : > { %v2643_v61 = vpack.c.bf16 %v1589_v58, %v1588_v57  ;;  %v1683_v3 = vld [vmem:[#allocation4 + $0xb0] sm:$0xff] }
 0x3cc   : > { %v1492_v6 = vadd.f32 %v1489_v2, %v1414_v56  ;;  %v2652_v56 = vpack.c.bf16 %v1680_v54, %v1679_v53  ;;  %v1591_v2 = vld [vmem:[#allocation4 + $0x38] sm:$0xff] }
 0x3cd   : > { %v2646_v5 = vpack.c.bf16 %v1591_v2, %v1590_v63 }
 0x3ce   : > { %v1493_v9 = vadd.f32 %v1492_v6, %v1341_v60  ;;  %v1682_v60 = vld [vmem:[#allocation4 + $0xa8] sm:$0xff]  ;;  %v2658_v6 = vpack.c.bf16 %v1684_v4, %v1683_v3 }
 0x3cf   : > { %v2655_v62 = vpack.c.bf16 %v1682_v60, %v1681_v59 }
 0x3d0   : > { %v1498_v12 = vadd.f32 %v1497_v7, %v1493_v9  ;;  %v1921_v9 = vld [vmem:[%s3373_s6 + $0x8] sm:$0xff] }
 0x3d1   : > { %v2661_v11 = vpack.c.bf16 %v1921_v9, %v1920_v8 }
 0x3d2   : > { %v1499_v16 = vmax.f32 %v1498_v12, 0.0  ;;  %v1923_v12 = vld [vmem:[%s3373_s6 + $0x18] sm:$0xff] }
 0x3d3   : > { %v2664_v15 = vpack.c.bf16 %v1923_v12, %v1922_v10 }
 0x3d4   : > { %1501 = vrot.lane.b32.xlu0 %v1499_v16, %s2832_s20 }
 0x446   : > { %v1502_v22 = vpop.permute.xlu0 %1501 }
 0x447   : > { %v1504_v24 = vmax.f32 %v1499_v16, %v1502_v22  ;;  %v1925_v16 = vld [vmem:[%s3373_s6 + $0x28] sm:$0xff] }
 0x449   : > { %2400 = vmatpush3.msra.mxu0 %v1504_v24 }
 0x44a   : > { %2402 = vmatmul.mubr.msk.f32.vlgmr.msra.gmra.mrb[8].mxu0 %vm1506_vm11, %v1505_v25  ;;  %2612 = vmatprep.subr.bf16.mxu0 %v2829_v46 }
 0x44b   : > { %2614 = vmatpush3.bf16.msra.mxu0 %v2613_v26  ;;  %2420 = vmatprep.mubr.msk.f32.mxu0 %vm2831_vm7, %v2827_v0  ;;  %v1915_v26 = vsub.s32 2, %v3072_v23 }
 0x44c   : > { %2615 = vmatprep.subr.bf16.mxu0 %v2829_v46 }
 0x44d   : > { %v1916_v30 = vrot.slane %v3080_v35, %v1915_v26 }
 0x44f   : > { %2617 = vmatpush3.bf16.msra.mxu0 %v2616_v29 }
 0x450   : > { %2618 = vmatprep.subr.bf16.mxu0 %v2829_v46 }
 0x453   : > { %2620 = vmatpush3.bf16.msra.mxu0 %v2619_v1 }
 0x454   : > { %2621 = vmatprep.subr.bf16.mxu0 %v2829_v46 }
 0x457   : > { %2623 = vmatpush3.bf16.msra.mxu0 %v2622_v33  ;;  %v1930_v33 = vsub.s32 3, %v3072_v23 }
 0x458   : > { %2636 = vmatprep.subr.bf16.mxu0 %v2829_v46 }
 0x459   : > { %v1931_v34 = vrot.slane %v3080_v35, %v1930_v33 }
 0x51d   : > { %v1576_v38 = vpop.f32.mrb[8].mxu0 }
 0x51e   : > { %v1581_v40 = vrot.slane %v1576_v38, 4  ;;  %v2403_v41 = vpop.f32.mrb[9].mxu0 }
 0x520   : > { %v1583_v45 = vmax.f32 %v1576_v38, %v1581_v40 }
 0x522   : > { %v1602_v50 = vrot.slane %v1583_v45, 1  ;;  %v1694_v51 = vrot.slane %v1583_v45, 3  ;;  %v1839_v7 = vrot.slane %v1583_v45, 2 }
 0x524   : > { %2421 = vmatmul.mubr.msk.f32.vlgmr.msra.gmra.mrb[10].mxu0 %vm1603_vm12, %v1602_v50  ;;  %2440 = vmatmul.mubr.msk.f32.vlgmr.msra.gmra.mrb[16].mxu1 %vm1603_vm12, %v1694_v51 }
 0x525   : > { %2638 = vmatpush3.bf16.msra.mxu0 %v2637_v47  ;;  %2650 = vmatpush3.bf16.msra.mxu1 %v2649_v48 }
 0x526   : > { %2639 = vmatprep.subr.bf16.mxu0 %v2829_v46  ;;  %2651 = vmatprep.subr.bf16.mxu1 %v2829_v46 }
 0x527   : > { %2458 = vmatprep.mubr.msk.f32.mxu0 %vm2831_vm7, %v2827_v0  ;;  %2477 = vmatprep.mubr.msk.f32.mxu1 %vm2831_vm7, %v2827_v0 }
 0x529   : > { %2641 = vmatpush3.bf16.msra.mxu0 %v2640_v55  ;;  %2653 = vmatpush3.bf16.msra.mxu1 %v2652_v56 }
 0x52a   : > { %2642 = vmatprep.subr.bf16.mxu0 %v2829_v46  ;;  %2654 = vmatprep.subr.bf16.mxu1 %v2829_v46 }
 0x52d   : > { %2644 = vmatpush3.bf16.msra.mxu0 %v2643_v61  ;;  %2656 = vmatpush3.bf16.msra.mxu1 %v2655_v62 }
 0x52e   : > { %2645 = vmatprep.subr.bf16.mxu0 %v2829_v46  ;;  %2657 = vmatprep.subr.bf16.mxu1 %v2829_v46 }
 0x531   : > { %2647 = vmatpush3.bf16.msra.mxu0 %v2646_v5  ;;  %2659 = vmatpush3.bf16.msra.mxu1 %v2658_v6 }
 0x532   : > { %2660 = vmatprep.subr.bf16.mxu0 %v2829_v46 }
 0x534   : > { %2459 = vmatmul.mubr.msk.f32.vlgmr.msra.gmra.mrb[12].mxu0 %vm1603_vm12, %v1583_v45  ;;  %2478 = vmatmul.mubr.msk.f32.vlgmr.msra.gmra.mrb[18].mxu1 %vm1603_vm12, %v1839_v7 }
 0x535   : > { %2496 = vmatprep.mubr.msk.f32.mxu0 %vm2831_vm7, %v2827_v0  ;;  %2662 = vmatpush3.bf16.msra.mxu0 %v2661_v11  ;;  %v1924_v0 = vld [vmem:[%s3373_s6 + $0x20] sm:$0xff] }
 0x536   : > { %2663 = vmatprep.subr.bf16.mxu0 %v2829_v46  ;;  %v2667_v17 = vpack.c.bf16 %v1925_v16, %v1924_v0 }
 0x539   : > { %2665 = vmatpush3.bf16.msra.mxu0 %v2664_v15 }
 0x53a   : > { %2666 = vmatprep.subr.bf16.mxu0 %v2829_v46 }
 0x53d   : > { %2668 = vmatpush3.bf16.msra.mxu0 %v2667_v17 }
 0x53e   : > { %2669 = vmatprep.subr.bf16.mxu0 %v2829_v46 }
 0x541   : > { %2671 = vmatpush3.bf16.msra.mxu0 %v2670_v20 }
 0x5f7   : > { %v1672_v21 = vpop.f32.mrb[10].mxu0  ;;  %v1763_v22 = vpop.f32.mrb[16].mxu1 }
 0x5f8   : > { %v2422_v24 = vpop.f32.mrb[11].mxu0  ;;  %v2441_v25 = vpop.f32.mrb[17].mxu1 }
 0x607   : > { %v1835_v27 = vpop.f32.mrb[12].mxu0  ;;  %v1908_v28 = vpop.f32.mrb[18].mxu1 }
 0x608   : > { %v1836_v46 = vadd.f32 %v1835_v27, %v1672_v21  ;;  %v1909_v29 = vadd.f32 %v1908_v28, %v1763_v22  ;;  %v2460_v31 = vpop.f32.mrb[13].mxu0  ;;  %v2479_v1 = vpop.f32.mrb[19].mxu1 }
 0x60a   : > { %v1912_v13 = vadd.f32 %v1909_v29, %v1836_v46 }
 0x60c   : > { %v1918_v14 = vadd.f32 %v1916_v30, %v1912_v13 }
 0x60e   : > { %v1919_v32 = vmax.f32 %v1918_v14, 0.0 }
 0x610   : > { %2497 = vmatmul.mubr.msk.f32.vlgmr.msra.gmra.mrb[14].mxu0 %vm1603_vm12, %v1919_v32 }
 0x6e3   : > { %v2002_v37 = vpop.f32.mrb[14].mxu0 }
 0x6e4   : > { %v2003_v38 = vadd.f32 %v2002_v37, %v1931_v34  ;;  %v2498_v39 = vpop.f32.mrb[15].mxu0 }
 0x6e6   : > { %v2009_v40 = vrot.slane %v2003_v38, %v3075_v36 }
 0x6e8   : > { %2010 = vst [vmem:[%s333_s22] sm:$0xff] %v2009_v40 }
 0x6e9 PF: > { %s20_s27 = sadd.s32 1, %s2819_s27  }
 0x6ea   : > { %p17_p5 = scmp.ge.s32.totalorder %s20_s27, 6  }
 0x6ec   :  { %19 = sbr.rel (!%p17_p5) target bundleno = 2 (0x2), region = 102 }
 0x6f3   :  { %2030 = vsyncpa [#allocation3], 1 }
 0x6f4   :  { %2032 = vsyncpa [#allocation3 + $0x1], 1 }
 0x6f5   :  { %2033 = vsyncpa [#allocation5], 1 }

</bundles_post_ra>
